<compile_context>
chip_gen: v6e
topology: v6e:2x2x1
jax: 0.10.0
libtpu: 0.0.40
codegen_flags: <defaults>
</compile_context>

<pallas_src>
import jax
import jax.numpy as jnp
from jax.experimental import pallas as pl
from jax.experimental.pallas import tpu as pltpu

HID = 64        # hid_size: last_fc expects 448 = 2*H + 3*H + 128  =>  H must be 64
C_FULL = 256    # fused full-branch conv C_out: 3*64 = 192, zero-padded to 256 (lane dense)
C_TITLE = 128   # title conv C_out = 2*H


# ----------------------------- Pallas kernel ------------------------------ #
def three_inputs_kernel(title_ref, full_ref, cat_ref,
                        wt_ref, wf_ref, wc_ref, wl_ref, b_ref,
                        out_ref):
    f32 = jnp.float32
    H = HID
    TB = title_ref.shape[0]
    L1 = title_ref.shape[1] // H            # title length
    Lp = full_ref.shape[1] // H             # full length + 4 (zero rows from the gather)
    lt = L1 - 1                             # title conv output length (k=2)
    lf = Lp - 6                             # fused 7-tap conv output length (= L2 - 2)

    # packed f32 biases: [bt 128 | bf 256 | bc 128 | bl 128]
    bt = b_ref[:, 0:128]                    # (1, 128)
    bfu = b_ref[:, 128:384]                 # (1, 256)
    bc = b_ref[:, 384:512]                  # (1, 128)
    bl = b_ref[:, 512:640]                  # (1, 128)  (only col 0 is the real last_fc bias)

    x_t = title_ref[...]                    # (TB, L1*H) bf16, lane-dense
    x_f = full_ref[...]                     # (TB, Lp*H) bf16, lane-dense
    wt = wt_ref[...]                        # (128, 128) bf16   rows = [tap0 ch | tap1 ch]
    wf = wf_ref[...]                        # (448, 256) bf16   rows = tap-major fused weight

    # ---- title branch: Conv1d(64 -> 128, k=2) + ReLU + max over time ----
    # per output position: contiguous 128-lane window, K=128 matmul, running max fold
    t_max = None
    for i in range(lt):
        y = jnp.dot(x_t[:, i * H:(i + 2) * H], wt, preferred_element_type=f32)
        t_max = y if t_max is None else jnp.maximum(t_max, y)
    t_feat = jnp.maximum(t_max + bt, 0.0)                       # (TB, 128) f32

    # ---- full branch: fused k=3/5/7 conv as one 7-tap (K=448) conv + ReLU + max ----
    f_max = None
    for i in range(lf):
        y = jnp.dot(x_f[:, i * H:(i + 7) * H], wf, preferred_element_type=f32)
        f_max = y if f_max is None else jnp.maximum(f_max, y)
    f_feat = jnp.maximum(f_max + bfu, 0.0)                      # (TB, 256) f32 (192 real)

    # ---- category branch: Linear(n_cat_pad -> 128) + ReLU ----
    c_feat = jnp.maximum(
        jnp.dot(cat_ref[...], wc_ref[...], preferred_element_type=f32) + bc, 0.0)  # (TB,128)

    # ---- last_fc: single fused (TB,512)@(512,128) matmul over lane-aligned concat ----
    feat = jnp.concatenate([t_feat, f_feat, c_feat], axis=1).astype(jnp.bfloat16)  # (TB,512)
    res = jnp.dot(feat, wl_ref[...], preferred_element_type=f32) + bl              # (TB,128)

    # only column 0 is real: transpose so the writeback is a lane-dense (1, TB) row
    out_ref[...] = jnp.transpose(res)[0:1, :].reshape(1, 1, TB)


# ------------------------- parameter packing (host) ------------------------ #
def pack_params(params, n_cat_pad):
    """Fuse / pad / pack raw parameters into the kernel's slab layout (done once)."""
    H = HID
    bf16 = jnp.bfloat16

    # title conv: (2, 64, 128) -> tap-major (128, 128)
    wt = params["wt"].reshape(2 * H, C_TITLE).astype(bf16)

    # fused full conv: k=3 at taps 2..4, k=5 at taps 1..5, k=7 at taps 0..6 (2/side pad);
    # C_out = [f1(64) | f2(64) | f3(64) | pad(64)] = 256; flattened tap-major K = 448
    wf = jnp.zeros((7, H, C_FULL), jnp.float32)
    wf = wf.at[2:5, :, 0:H].set(params["wf1"])
    wf = wf.at[1:6, :, H:2 * H].set(params["wf2"])
    wf = wf.at[0:7, :, 2 * H:3 * H].set(params["wf3"])
    wf = wf.reshape(7 * H, C_FULL).astype(bf16)

    # category linear: pad K (= n_cat) up to a lane multiple with zero rows
    n_cat = params["wc"].shape[0]
    wc = jnp.zeros((n_cat_pad, C_TITLE), jnp.float32)
    wc = wc.at[0:n_cat, :].set(params["wc"]).astype(bf16)

    # last_fc (448,1) -> (512,128): rows [title 128 | full 192 + 64 pad | cat 128], col 0 real
    wl = jnp.zeros((512, 128), jnp.float32)
    wl = wl.at[0:128, 0].set(params["wl"][0:128, 0])
    wl = wl.at[128:320, 0].set(params["wl"][128:320, 0])
    wl = wl.at[384:512, 0].set(params["wl"][320:448, 0])
    wl = wl.astype(bf16)

    # all biases in one f32 row: [bt 128 | bf1 bf2 bf3 pad = 256 | bc 128 | bl 128]
    biases = jnp.zeros((1, 640), jnp.float32)
    biases = biases.at[0, 0:128].set(params["bt"][0])
    biases = biases.at[0, 128:192].set(params["bf1"][0])
    biases = biases.at[0, 192:256].set(params["bf2"][0])
    biases = biases.at[0, 256:320].set(params["bf3"][0])
    biases = biases.at[0, 384:512].set(params["bc"][0])
    biases = biases.at[0, 512].set(params["bl"][0, 0])
    return wt, wf, wc, wl, biases


# ------------------------------- wrapper ---------------------------------- #
def _three_inputs_net_impl(params, input1, input2, input3, *, block_b=128):
    H = HID
    B, L1 = input1.shape
    _, L2 = input2.shape
    n_cat = input3.shape[1]
    n_tokens = params["full_emb"].shape[0]
    assert L1 >= 2 and L2 >= 3, "conv output lengths must be positive"
    assert params["title_emb"].shape[1] == H, "ThreeInputsNet requires hid_size == 64"

    # batch block: multiple of 8 sublanes; prefer >= 2 blocks so both v7x TensorCores
    # get work (the flag is a no-op on single-TC v5e/v6e).
    B8 = ((B + 7) // 8) * 8
    TB = max(8, (min(block_b, B8) // 8) * 8)
    if B8 // TB < 2 and B8 >= 16:
        TB = max(8, ((B8 // 2 + 7) // 8) * 8)
    B_pad = ((B + TB - 1) // TB) * TB
    pad_b = B_pad - B
    grid_b = B_pad // TB
    n_cat_pad = ((n_cat + 127) // 128) * 128
    Lp = L2 + 4

    wt, wf, wc, wl, biases = pack_params(params, n_cat_pad)

    # Embedding gather stays in plain JAX (glue).  The full-text time padding is folded
    # into the gather via an appended all-zero embedding row, and the gathered activations
    # are flattened to a lane-dense (B_pad, L*64) layout before entering the kernel.
    # TODO(synk): move the gather in-kernel (scalar-prefetched token ids + DMA row gather
    # from the HBM tables) to remove this activation HBM round trip at large batch.
    emb_t = params["title_emb"].astype(jnp.bfloat16)
    emb_f = jnp.concatenate(
        [params["full_emb"], jnp.zeros((1, H), params["full_emb"].dtype)], axis=0
    ).astype(jnp.bfloat16)

    ids_t = jnp.pad(input1, ((0, pad_b), (0, 0)))                       # batch pad: token 0
    ids_f = jnp.pad(jnp.pad(input2, ((0, pad_b), (0, 0))),
                    ((0, 0), (2, 2)), constant_values=n_tokens)         # time pad: zero row
    title_e = emb_t[ids_t].reshape(B_pad, L1 * H)                       # (B_pad, L1*64) bf16
    full_e = emb_f[ids_f].reshape(B_pad, Lp * H)                        # (B_pad, (L2+4)*64)
    cat = jnp.pad(input3.astype(jnp.bfloat16),
                  ((0, pad_b), (0, n_cat_pad - n_cat)))                 # (B_pad, 128) bf16

    out = pl.pallas_call(
        three_inputs_kernel,
        out_shape=jax.ShapeDtypeStruct((grid_b, 1, TB), jnp.float32),
        grid=(grid_b,),
        in_specs=[
            pl.BlockSpec((TB, L1 * H), lambda b: (b, 0)),
            pl.BlockSpec((TB, Lp * H), lambda b: (b, 0)),
            pl.BlockSpec((TB, n_cat_pad), lambda b: (b, 0)),
            pl.BlockSpec((2 * H, C_TITLE), lambda b: (0, 0)),
            pl.BlockSpec((7 * H, C_FULL), lambda b: (0, 0)),
            pl.BlockSpec((n_cat_pad, C_TITLE), lambda b: (0, 0)),
            pl.BlockSpec((512, 128), lambda b: (0, 0)),
            pl.BlockSpec((1, 640), lambda b: (0, 0)),
        ],
        out_specs=pl.BlockSpec((1, 1, TB), lambda b: (b, 0, 0)),
        compiler_params=pltpu.CompilerParams(
            dimension_semantics=("parallel",),   # v7x: shard batch blocks across both TCs
        ),
    )(title_e, full_e, cat, wt, wf, wc, wl, biases)

    return out.reshape(B_pad, 1)[:B]             # lane-dense rows -> (B, 1) result


three_inputs_net = jax.jit(_three_inputs_net_impl, static_argnames=("block_b",))


# ------------------------- deterministic params ---------------------------- #
def init_params(key, n_tokens, n_cat_features, hid_size=HID):
    H = hid_size
    ks = jax.random.split(key, 12)

    def nrm(k, shape, scale=0.05):
        return (scale * jax.random.normal(k, shape)).astype(jnp.float32)

    return dict(
        title_emb=nrm(ks[0], (n_tokens, H), 1.0),
        full_emb=nrm(ks[1], (n_tokens, H), 1.0),
        # conv weights stored as (k, C_in, C_out)  (torch layout is (C_out, C_in, k))
        wt=nrm(ks[2], (2, H, 2 * H)), bt=nrm(ks[3], (1, 2 * H)),
        wf1=nrm(ks[4], (3, H, H)), bf1=nrm(ks[5], (1, H)),
        wf2=nrm(ks[6], (5, H, H)), bf2=nrm(ks[7], (1, H)),
        wf3=nrm(ks[8], (7, H, H)), bf3=nrm(ks[9], (1, H)),
        wc=nrm(ks[10], (n_cat_features, 128)), bc=jnp.zeros((1, 128), jnp.float32),
        wl=nrm(ks[11], (448, 1)), bl=jnp.zeros((1, 1), jnp.float32),
    )


# -------------------------- plain-JAX reference ---------------------------- #
def reference(params, input1, input2, input3):
    f32 = jnp.float32
    q = lambda x: x.astype(jnp.bfloat16).astype(f32)   # mimic the kernel's bf16 operands

    def conv1d(x_ncl, w_kio, b, pad):
        wk = jnp.transpose(q(w_kio), (2, 1, 0))                    # (O, I, k)
        y = jax.lax.conv_general_dilated(
            x_ncl, wk, window_strides=(1,), padding=[(pad, pad)],
            dimension_numbers=("NCW", "OIW", "NCW"),
            precision=jax.lax.Precision.HIGHEST)
        return y + b[0][None, :, None]

    title_e = q(params["title_emb"])[input1].transpose(0, 2, 1)    # (B, H, L1)
    t = jnp.max(jax.nn.relu(conv1d(title_e, params["wt"], params["bt"], 0)), axis=2)
    full_e = q(params["full_emb"])[input2].transpose(0, 2, 1)      # (B, H, L2)
    f1 = jnp.max(jax.nn.relu(conv1d(full_e, params["wf1"], params["bf1"], 0)), axis=2)
    f2 = jnp.max(jax.nn.relu(conv1d(full_e, params["wf2"], params["bf2"], 1)), axis=2)
    f3 = jnp.max(jax.nn.relu(conv1d(full_e, params["wf3"], params["bf3"], 2)), axis=2)
    c = jax.nn.relu(jnp.dot(q(input3), q(params["wc"]),
                            precision=jax.lax.Precision.HIGHEST) + params["bc"])
    feat = jnp.concatenate([t, f1, f2, f3, c], axis=1)             # (B, 448)
    return jnp.dot(q(feat), q(params["wl"]),
                   precision=jax.lax.Precision.HIGHEST) + params["bl"]


if __name__ == "__main__":
    key = jax.random.PRNGKey(0)
    n_tokens, n_cat = 50, 8
    B, L1, L2 = 2, 8, 16

    kp, k1, k2, k3 = jax.random.split(key, 4)
    params = init_params(kp, n_tokens, n_cat, HID)
    input1 = jax.random.randint(k1, (B, L1), 0, n_tokens)           # title tokens
    input2 = jax.random.randint(k2, (B, L2), 0, n_tokens)           # full-text tokens
    input3 = jax.random.normal(k3, (B, n_cat), dtype=jnp.float32)   # categorical features

    out = jax.block_until_ready(three_inputs_net(params, input1, input2, input3))
    ref = reference(params, input1, input2, input3)
    assert out.shape == (B, 1), out.shape
    assert jnp.allclose(out, ref, atol=2e-3, rtol=2e-3), (out, ref)

    # second check: multi-block grid + batch padding path
    B2 = 20
    i1 = jax.random.randint(jax.random.PRNGKey(1), (B2, L1), 0, n_tokens)
    i2 = jax.random.randint(jax.random.PRNGKey(2), (B2, L2), 0, n_tokens)
    i3 = jax.random.normal(jax.random.PRNGKey(3), (B2, n_cat), dtype=jnp.float32)
    out2 = jax.block_until_ready(three_inputs_net(params, i1, i2, i3))
    ref2 = reference(params, i1, i2, i3)
    assert out2.shape == (B2, 1), out2.shape
    assert jnp.allclose(out2, ref2, atol=2e-3, rtol=2e-3), (out2, ref2)

    print("KERNEL_OK")
</pallas_src>

<mosaic_0001>
module attributes {stable_mosaic.version = 11 : i64} {
  func.func @three_inputs_kernel(%arg0: i32, %arg1: memref<8x512xbf16, #tpu.memory_space<vmem>>, %arg2: memref<8x1280xbf16, #tpu.memory_space<vmem>>, %arg3: memref<8x128xbf16, #tpu.memory_space<vmem>>, %arg4: memref<128x128xbf16, #tpu.memory_space<vmem>>, %arg5: memref<448x256xbf16, #tpu.memory_space<vmem>>, %arg6: memref<128x128xbf16, #tpu.memory_space<vmem>>, %arg7: memref<512x128xbf16, #tpu.memory_space<vmem>>, %arg8: memref<1x640xf32, #tpu.memory_space<vmem>>, %arg9: memref<1x1x8xf32, #tpu.memory_space<vmem>>) attributes {dimension_semantics = [#tpu.dimension_semantics<parallel>], iteration_bounds = array<i64: 1>, scalar_prefetch = 0 : i64, scratch_operands = 0 : i64, tpu.core_type = #tpu.core_type<tc>, window_params = [{transform_indices = @transform_0, window_bounds = array<i64: 8, 512>}, {transform_indices = @transform_1, window_bounds = array<i64: 8, 1280>}, {transform_indices = @transform_2, window_bounds = array<i64: 8, 128>}, {pipeline_mode = #tpu.pipeline_mode<synchronous>, transform_indices = @transform_3, window_bounds = array<i64: 128, 128>}, {pipeline_mode = #tpu.pipeline_mode<synchronous>, transform_indices = @transform_4, window_bounds = array<i64: 448, 256>}, {pipeline_mode = #tpu.pipeline_mode<synchronous>, transform_indices = @transform_5, window_bounds = array<i64: 128, 128>}, {pipeline_mode = #tpu.pipeline_mode<synchronous>, transform_indices = @transform_6, window_bounds = array<i64: 512, 128>}, {pipeline_mode = #tpu.pipeline_mode<synchronous>, transform_indices = @transform_7, window_bounds = array<i64: 1, 640>}, {transform_indices = @transform_8, window_bounds = array<i64: 1, 1, 8>}]} {
    %c0 = arith.constant 0 : index
    %c0_0 = arith.constant 0 : index
    %0 = vector.load %arg8[%c0, %c0_0] : memref<1x640xf32, #tpu.memory_space<vmem>>, vector<1x128xf32>
    %c0_1 = arith.constant 0 : index
    %c128 = arith.constant 128 : index
    %1 = vector.load %arg8[%c0_1, %c128] : memref<1x640xf32, #tpu.memory_space<vmem>>, vector<1x256xf32>
    %c0_2 = arith.constant 0 : index
    %c384 = arith.constant 384 : index
    %2 = vector.load %arg8[%c0_2, %c384] : memref<1x640xf32, #tpu.memory_space<vmem>>, vector<1x128xf32>
    %c0_3 = arith.constant 0 : index
    %c512 = arith.constant 512 : index
    %3 = vector.load %arg8[%c0_3, %c512] : memref<1x640xf32, #tpu.memory_space<vmem>>, vector<1x128xf32>
    %c0_4 = arith.constant 0 : index
    %c0_5 = arith.constant 0 : index
    %4 = vector.load %arg1[%c0_4, %c0_5] : memref<8x512xbf16, #tpu.memory_space<vmem>>, vector<8x512xbf16>
    %c0_6 = arith.constant 0 : index
    %c0_7 = arith.constant 0 : index
    %5 = vector.load %arg2[%c0_6, %c0_7] : memref<8x1280xbf16, #tpu.memory_space<vmem>>, vector<8x1280xbf16>
    %c0_8 = arith.constant 0 : index
    %c0_9 = arith.constant 0 : index
    %6 = vector.load %arg4[%c0_8, %c0_9] : memref<128x128xbf16, #tpu.memory_space<vmem>>, vector<128x128xbf16>
    %c0_10 = arith.constant 0 : index
    %c0_11 = arith.constant 0 : index
    %7 = vector.load %arg5[%c0_10, %c0_11] : memref<448x256xbf16, #tpu.memory_space<vmem>>, vector<448x256xbf16>
    %8 = vector.extract_strided_slice %4 {offsets = [0, 0], sizes = [8, 128], strides = [1, 1]} : vector<8x512xbf16> to vector<8x128xbf16>
    %cst = arith.constant dense<0.000000e+00> : vector<8x128xf32>
    %9 = tpu.matmul %8, %6, %cst {dimension_numbers = #tpu.dot_dimension_numbers<[1], [0], [0], [1], [0, 0, 1, 1], [], []>} : vector<8x128xbf16>, vector<128x128xbf16>, vector<8x128xf32> -> vector<8x128xf32>
    %10 = vector.extract_strided_slice %4 {offsets = [0, 64], sizes = [8, 128], strides = [1, 1]} : vector<8x512xbf16> to vector<8x128xbf16>
    %cst_12 = arith.constant dense<0.000000e+00> : vector<8x128xf32>
    %11 = tpu.matmul %10, %6, %cst_12 {dimension_numbers = #tpu.dot_dimension_numbers<[1], [0], [0], [1], [0, 0, 1, 1], [], []>} : vector<8x128xbf16>, vector<128x128xbf16>, vector<8x128xf32> -> vector<8x128xf32>
    %12 = arith.maximumf %9, %11 : vector<8x128xf32>
    %13 = vector.extract_strided_slice %4 {offsets = [0, 128], sizes = [8, 128], strides = [1, 1]} : vector<8x512xbf16> to vector<8x128xbf16>
    %cst_13 = arith.constant dense<0.000000e+00> : vector<8x128xf32>
    %14 = tpu.matmul %13, %6, %cst_13 {dimension_numbers = #tpu.dot_dimension_numbers<[1], [0], [0], [1], [0, 0, 1, 1], [], []>} : vector<8x128xbf16>, vector<128x128xbf16>, vector<8x128xf32> -> vector<8x128xf32>
    %15 = arith.maximumf %12, %14 : vector<8x128xf32>
    %16 = vector.extract_strided_slice %4 {offsets = [0, 192], sizes = [8, 128], strides = [1, 1]} : vector<8x512xbf16> to vector<8x128xbf16>
    %cst_14 = arith.constant dense<0.000000e+00> : vector<8x128xf32>
    %17 = tpu.matmul %16, %6, %cst_14 {dimension_numbers = #tpu.dot_dimension_numbers<[1], [0], [0], [1], [0, 0, 1, 1], [], []>} : vector<8x128xbf16>, vector<128x128xbf16>, vector<8x128xf32> -> vector<8x128xf32>
    %18 = arith.maximumf %15, %17 : vector<8x128xf32>
    %19 = vector.extract_strided_slice %4 {offsets = [0, 256], sizes = [8, 128], strides = [1, 1]} : vector<8x512xbf16> to vector<8x128xbf16>
    %cst_15 = arith.constant dense<0.000000e+00> : vector<8x128xf32>
    %20 = tpu.matmul %19, %6, %cst_15 {dimension_numbers = #tpu.dot_dimension_numbers<[1], [0], [0], [1], [0, 0, 1, 1], [], []>} : vector<8x128xbf16>, vector<128x128xbf16>, vector<8x128xf32> -> vector<8x128xf32>
    %21 = arith.maximumf %18, %20 : vector<8x128xf32>
    %22 = vector.extract_strided_slice %4 {offsets = [0, 320], sizes = [8, 128], strides = [1, 1]} : vector<8x512xbf16> to vector<8x128xbf16>
    %cst_16 = arith.constant dense<0.000000e+00> : vector<8x128xf32>
    %23 = tpu.matmul %22, %6, %cst_16 {dimension_numbers = #tpu.dot_dimension_numbers<[1], [0], [0], [1], [0, 0, 1, 1], [], []>} : vector<8x128xbf16>, vector<128x128xbf16>, vector<8x128xf32> -> vector<8x128xf32>
    %24 = arith.maximumf %21, %23 : vector<8x128xf32>
    %25 = vector.extract_strided_slice %4 {offsets = [0, 384], sizes = [8, 128], strides = [1, 1]} : vector<8x512xbf16> to vector<8x128xbf16>
    %cst_17 = arith.constant dense<0.000000e+00> : vector<8x128xf32>
    %26 = tpu.matmul %25, %6, %cst_17 {dimension_numbers = #tpu.dot_dimension_numbers<[1], [0], [0], [1], [0, 0, 1, 1], [], []>} : vector<8x128xbf16>, vector<128x128xbf16>, vector<8x128xf32> -> vector<8x128xf32>
    %27 = arith.maximumf %24, %26 : vector<8x128xf32>
    %28 = vector.broadcast %0 : vector<1x128xf32> to vector<8x128xf32>
    %29 = arith.addf %27, %28 : vector<8x128xf32>
    %cst_18 = arith.constant 0.000000e+00 : f32
    %30 = vector.broadcast %cst_18 : f32 to vector<8x128xf32>
    %31 = arith.maximumf %29, %30 : vector<8x128xf32>
    %32 = vector.extract_strided_slice %5 {offsets = [0, 0], sizes = [8, 448], strides = [1, 1]} : vector<8x1280xbf16> to vector<8x448xbf16>
    %cst_19 = arith.constant dense<0.000000e+00> : vector<8x256xf32>
    %33 = tpu.matmul %32, %7, %cst_19 {dimension_numbers = #tpu.dot_dimension_numbers<[1], [0], [0], [1], [0, 0, 1, 1], [], []>} : vector<8x448xbf16>, vector<448x256xbf16>, vector<8x256xf32> -> vector<8x256xf32>
    %34 = vector.extract_strided_slice %5 {offsets = [0, 64], sizes = [8, 448], strides = [1, 1]} : vector<8x1280xbf16> to vector<8x448xbf16>
    %cst_20 = arith.constant dense<0.000000e+00> : vector<8x256xf32>
    %35 = tpu.matmul %34, %7, %cst_20 {dimension_numbers = #tpu.dot_dimension_numbers<[1], [0], [0], [1], [0, 0, 1, 1], [], []>} : vector<8x448xbf16>, vector<448x256xbf16>, vector<8x256xf32> -> vector<8x256xf32>
    %36 = arith.maximumf %33, %35 : vector<8x256xf32>
    %37 = vector.extract_strided_slice %5 {offsets = [0, 128], sizes = [8, 448], strides = [1, 1]} : vector<8x1280xbf16> to vector<8x448xbf16>
    %cst_21 = arith.constant dense<0.000000e+00> : vector<8x256xf32>
    %38 = tpu.matmul %37, %7, %cst_21 {dimension_numbers = #tpu.dot_dimension_numbers<[1], [0], [0], [1], [0, 0, 1, 1], [], []>} : vector<8x448xbf16>, vector<448x256xbf16>, vector<8x256xf32> -> vector<8x256xf32>
    %39 = arith.maximumf %36, %38 : vector<8x256xf32>
    %40 = vector.extract_strided_slice %5 {offsets = [0, 192], sizes = [8, 448], strides = [1, 1]} : vector<8x1280xbf16> to vector<8x448xbf16>
    %cst_22 = arith.constant dense<0.000000e+00> : vector<8x256xf32>
    %41 = tpu.matmul %40, %7, %cst_22 {dimension_numbers = #tpu.dot_dimension_numbers<[1], [0], [0], [1], [0, 0, 1, 1], [], []>} : vector<8x448xbf16>, vector<448x256xbf16>, vector<8x256xf32> -> vector<8x256xf32>
    %42 = arith.maximumf %39, %41 : vector<8x256xf32>
    %43 = vector.extract_strided_slice %5 {offsets = [0, 256], sizes = [8, 448], strides = [1, 1]} : vector<8x1280xbf16> to vector<8x448xbf16>
    %cst_23 = arith.constant dense<0.000000e+00> : vector<8x256xf32>
    %44 = tpu.matmul %43, %7, %cst_23 {dimension_numbers = #tpu.dot_dimension_numbers<[1], [0], [0], [1], [0, 0, 1, 1], [], []>} : vector<8x448xbf16>, vector<448x256xbf16>, vector<8x256xf32> -> vector<8x256xf32>
    %45 = arith.maximumf %42, %44 : vector<8x256xf32>
    %46 = vector.extract_strided_slice %5 {offsets = [0, 320], sizes = [8, 448], strides = [1, 1]} : vector<8x1280xbf16> to vector<8x448xbf16>
    %cst_24 = arith.constant dense<0.000000e+00> : vector<8x256xf32>
    %47 = tpu.matmul %46, %7, %cst_24 {dimension_numbers = #tpu.dot_dimension_numbers<[1], [0], [0], [1], [0, 0, 1, 1], [], []>} : vector<8x448xbf16>, vector<448x256xbf16>, vector<8x256xf32> -> vector<8x256xf32>
    %48 = arith.maximumf %45, %47 : vector<8x256xf32>
    %49 = vector.extract_strided_slice %5 {offsets = [0, 384], sizes = [8, 448], strides = [1, 1]} : vector<8x1280xbf16> to vector<8x448xbf16>
    %cst_25 = arith.constant dense<0.000000e+00> : vector<8x256xf32>
    %50 = tpu.matmul %49, %7, %cst_25 {dimension_numbers = #tpu.dot_dimension_numbers<[1], [0], [0], [1], [0, 0, 1, 1], [], []>} : vector<8x448xbf16>, vector<448x256xbf16>, vector<8x256xf32> -> vector<8x256xf32>
    %51 = arith.maximumf %48, %50 : vector<8x256xf32>
    %52 = vector.extract_strided_slice %5 {offsets = [0, 448], sizes = [8, 448], strides = [1, 1]} : vector<8x1280xbf16> to vector<8x448xbf16>
    %cst_26 = arith.constant dense<0.000000e+00> : vector<8x256xf32>
    %53 = tpu.matmul %52, %7, %cst_26 {dimension_numbers = #tpu.dot_dimension_numbers<[1], [0], [0], [1], [0, 0, 1, 1], [], []>} : vector<8x448xbf16>, vector<448x256xbf16>, vector<8x256xf32> -> vector<8x256xf32>
    %54 = arith.maximumf %51, %53 : vector<8x256xf32>
    %55 = vector.extract_strided_slice %5 {offsets = [0, 512], sizes = [8, 448], strides = [1, 1]} : vector<8x1280xbf16> to vector<8x448xbf16>
    %cst_27 = arith.constant dense<0.000000e+00> : vector<8x256xf32>
    %56 = tpu.matmul %55, %7, %cst_27 {dimension_numbers = #tpu.dot_dimension_numbers<[1], [0], [0], [1], [0, 0, 1, 1], [], []>} : vector<8x448xbf16>, vector<448x256xbf16>, vector<8x256xf32> -> vector<8x256xf32>
    %57 = arith.maximumf %54, %56 : vector<8x256xf32>
    %58 = vector.extract_strided_slice %5 {offsets = [0, 576], sizes = [8, 448], strides = [1, 1]} : vector<8x1280xbf16> to vector<8x448xbf16>
    %cst_28 = arith.constant dense<0.000000e+00> : vector<8x256xf32>
    %59 = tpu.matmul %58, %7, %cst_28 {dimension_numbers = #tpu.dot_dimension_numbers<[1], [0], [0], [1], [0, 0, 1, 1], [], []>} : vector<8x448xbf16>, vector<448x256xbf16>, vector<8x256xf32> -> vector<8x256xf32>
    %60 = arith.maximumf %57, %59 : vector<8x256xf32>
    %61 = vector.extract_strided_slice %5 {offsets = [0, 640], sizes = [8, 448], strides = [1, 1]} : vector<8x1280xbf16> to vector<8x448xbf16>
    %cst_29 = arith.constant dense<0.000000e+00> : vector<8x256xf32>
    %62 = tpu.matmul %61, %7, %cst_29 {dimension_numbers = #tpu.dot_dimension_numbers<[1], [0], [0], [1], [0, 0, 1, 1], [], []>} : vector<8x448xbf16>, vector<448x256xbf16>, vector<8x256xf32> -> vector<8x256xf32>
    %63 = arith.maximumf %60, %62 : vector<8x256xf32>
    %64 = vector.extract_strided_slice %5 {offsets = [0, 704], sizes = [8, 448], strides = [1, 1]} : vector<8x1280xbf16> to vector<8x448xbf16>
    %cst_30 = arith.constant dense<0.000000e+00> : vector<8x256xf32>
    %65 = tpu.matmul %64, %7, %cst_30 {dimension_numbers = #tpu.dot_dimension_numbers<[1], [0], [0], [1], [0, 0, 1, 1], [], []>} : vector<8x448xbf16>, vector<448x256xbf16>, vector<8x256xf32> -> vector<8x256xf32>
    %66 = arith.maximumf %63, %65 : vector<8x256xf32>
    %67 = vector.extract_strided_slice %5 {offsets = [0, 768], sizes = [8, 448], strides = [1, 1]} : vector<8x1280xbf16> to vector<8x448xbf16>
    %cst_31 = arith.constant dense<0.000000e+00> : vector<8x256xf32>
    %68 = tpu.matmul %67, %7, %cst_31 {dimension_numbers = #tpu.dot_dimension_numbers<[1], [0], [0], [1], [0, 0, 1, 1], [], []>} : vector<8x448xbf16>, vector<448x256xbf16>, vector<8x256xf32> -> vector<8x256xf32>
    %69 = arith.maximumf %66, %68 : vector<8x256xf32>
    %70 = vector.extract_strided_slice %5 {offsets = [0, 832], sizes = [8, 448], strides = [1, 1]} : vector<8x1280xbf16> to vector<8x448xbf16>
    %cst_32 = arith.constant dense<0.000000e+00> : vector<8x256xf32>
    %71 = tpu.matmul %70, %7, %cst_32 {dimension_numbers = #tpu.dot_dimension_numbers<[1], [0], [0], [1], [0, 0, 1, 1], [], []>} : vector<8x448xbf16>, vector<448x256xbf16>, vector<8x256xf32> -> vector<8x256xf32>
    %72 = arith.maximumf %69, %71 : vector<8x256xf32>
    %73 = vector.broadcast %1 : vector<1x256xf32> to vector<8x256xf32>
    %74 = arith.addf %72, %73 : vector<8x256xf32>
    %cst_33 = arith.constant 0.000000e+00 : f32
    %75 = vector.broadcast %cst_33 : f32 to vector<8x256xf32>
    %76 = arith.maximumf %74, %75 : vector<8x256xf32>
    %c0_34 = arith.constant 0 : index
    %c0_35 = arith.constant 0 : index
    %77 = vector.load %arg3[%c0_34, %c0_35] : memref<8x128xbf16, #tpu.memory_space<vmem>>, vector<8x128xbf16>
    %c0_36 = arith.constant 0 : index
    %c0_37 = arith.constant 0 : index
    %78 = vector.load %arg6[%c0_36, %c0_37] : memref<128x128xbf16, #tpu.memory_space<vmem>>, vector<128x128xbf16>
    %cst_38 = arith.constant dense<0.000000e+00> : vector<8x128xf32>
    %79 = tpu.matmul %77, %78, %cst_38 {dimension_numbers = #tpu.dot_dimension_numbers<[1], [0], [0], [1], [0, 0, 1, 1], [], []>} : vector<8x128xbf16>, vector<128x128xbf16>, vector<8x128xf32> -> vector<8x128xf32>
    %80 = vector.broadcast %2 : vector<1x128xf32> to vector<8x128xf32>
    %81 = arith.addf %79, %80 : vector<8x128xf32>
    %cst_39 = arith.constant 0.000000e+00 : f32
    %82 = vector.broadcast %cst_39 : f32 to vector<8x128xf32>
    %83 = arith.maximumf %81, %82 : vector<8x128xf32>
    %84 = tpu.concatenate %31, %76, %83 in 1 : vector<8x128xf32>, vector<8x256xf32>, vector<8x128xf32> -> vector<8x512xf32>
    %85 = arith.truncf %84 : vector<8x512xf32> to vector<8x512xbf16>
    %c0_40 = arith.constant 0 : index
    %c0_41 = arith.constant 0 : index
    %86 = vector.load %arg7[%c0_40, %c0_41] : memref<512x128xbf16, #tpu.memory_space<vmem>>, vector<512x128xbf16>
    %cst_42 = arith.constant dense<0.000000e+00> : vector<8x128xf32>
    %87 = tpu.matmul %85, %86, %cst_42 {dimension_numbers = #tpu.dot_dimension_numbers<[1], [0], [0], [1], [0, 0, 1, 1], [], []>} : vector<8x512xbf16>, vector<512x128xbf16>, vector<8x128xf32> -> vector<8x128xf32>
    %88 = vector.broadcast %3 : vector<1x128xf32> to vector<8x128xf32>
    %89 = arith.addf %87, %88 : vector<8x128xf32>
    %90 = tpu.transpose %89, [1, 0] : vector<8x128xf32> -> vector<128x8xf32>
    %91 = vector.extract_strided_slice %90 {offsets = [0, 0], sizes = [1, 8], strides = [1, 1]} : vector<128x8xf32> to vector<1x8xf32>
    %92 = vector.shape_cast %91 : vector<1x8xf32> to vector<1x1x8xf32>
    %c0_43 = arith.constant 0 : index
    %c0_44 = arith.constant 0 : index
    %c0_45 = arith.constant 0 : index
    %93 = vector.load %arg9[%c0_43, %c0_44, %c0_45] : memref<1x1x8xf32, #tpu.memory_space<vmem>>, vector<1x1x8xf32>
    tpu.vector_store %arg9[%c0_43, %c0_44, %c0_45], %92 {strides = array<i32>} : memref<1x1x8xf32, #tpu.memory_space<vmem>>, vector<1x1x8xf32>,
    return
  }
  func.func @transform_0(%arg0: i32) -> (i32, i32) {
    %c0_i32 = arith.constant 0 : i32
    %c0_i32_0 = arith.constant 0 : i32
    return %arg0, %c0_i32 : i32, i32
  }
  func.func @transform_1(%arg0: i32) -> (i32, i32) {
    %c0_i32 = arith.constant 0 : i32
    %c0_i32_0 = arith.constant 0 : i32
    return %arg0, %c0_i32 : i32, i32
  }
  func.func @transform_2(%arg0: i32) -> (i32, i32) {
    %c0_i32 = arith.constant 0 : i32
    %c0_i32_0 = arith.constant 0 : i32
    return %arg0, %c0_i32 : i32, i32
  }
  func.func @transform_3(%arg0: i32) -> (i32, i32) {
    %c0_i32 = arith.constant 0 : i32
    %c0_i32_0 = arith.constant 0 : i32
    %c0_i32_1 = arith.constant 0 : i32
    return %c0_i32, %c0_i32_0 : i32, i32
  }
  func.func @transform_4(%arg0: i32) -> (i32, i32) {
    %c0_i32 = arith.constant 0 : i32
    %c0_i32_0 = arith.constant 0 : i32
    %c0_i32_1 = arith.constant 0 : i32
    return %c0_i32, %c0_i32_0 : i32, i32
  }
  func.func @transform_5(%arg0: i32) -> (i32, i32) {
    %c0_i32 = arith.constant 0 : i32
    %c0_i32_0 = arith.constant 0 : i32
    %c0_i32_1 = arith.constant 0 : i32
    return %c0_i32, %c0_i32_0 : i32, i32
  }
  func.func @transform_6(%arg0: i32) -> (i32, i32) {
    %c0_i32 = arith.constant 0 : i32
    %c0_i32_0 = arith.constant 0 : i32
    %c0_i32_1 = arith.constant 0 : i32
    return %c0_i32, %c0_i32_0 : i32, i32
  }
  func.func @transform_7(%arg0: i32) -> (i32, i32) {
    %c0_i32 = arith.constant 0 : i32
    %c0_i32_0 = arith.constant 0 : i32
    %c0_i32_1 = arith.constant 0 : i32
    return %c0_i32, %c0_i32_0 : i32, i32
  }
  func.func @transform_8(%arg0: i32) -> (i32, i32, i32) {
    %c0_i32 = arith.constant 0 : i32
    %c0_i32_0 = arith.constant 0 : i32
    %c0_i32_1 = arith.constant 0 : i32
    return %arg0, %c0_i32, %c0_i32_0 : i32, i32, i32
  }
}

</mosaic_0001>

<bundles_post_ra>
// kernel: _three_inputs_net_impl.1
= control target key start
LH: loop header
LB: loop body
LE: loop exit
PB: predicated region body
PF: predicated region fallthrough
CT: control target
= control target key end

     0   :  { %v5293_v0 = vmov 0.0   ;;  %vm3179_vm0 = vmmov 0   ;;  %s3180_s13 = smov 64   ;;  %vm210_vm1 = vcmask 523264   ;;  %vm2556_vm2 = vcmask 57344   ;;  %s5284_s3 = inlined_call_operand.vmem [shape: bf16[128,128], index: 3, kind: input, shape index: {}]   ;;  %s5285_s0 = inlined_call_operand.vmem [shape: bf16[8,512], index: 0, kind: input, shape index: {}]   ;;  %s5286_s1 = inlined_call_operand.vmem [shape: bf16[8,1280], index: 1, kind: input, shape index: {}]   ;;  %s5287_s4 = inlined_call_operand.vmem [shape: bf16[448,256], index: 4, kind: input, shape index: {}]   ;;  %s5288_s5 = inlined_call_operand.vmem [shape: bf16[128,128], index: 5, kind: input, shape index: {}]   ;;  %s5289_s2 = inlined_call_operand.vmem [shape: bf16[8,128], index: 2, kind: input, shape index: {}]   ;;  %s5290_s6 = inlined_call_operand.vmem [shape: bf16[512,128], index: 6, kind: input, shape index: {}]   ;;  %s5291_s7 = inlined_call_operand.vmem [shape: f32[1,640], index: 7, kind: input, shape index: {}]   ;;  %s5292_s8 = inlined_call_operand.vmem [shape: f32[1,1,8], index: 8, kind: output, shape index: {}]  }
   0x1   :  { %2813 = vmatprep.subr.bf16.mxu0 %v5293_v0  ;;  %v3230_v1 = vld [vmem:[%s5284_s3 + $0x38] sm:$0xff]   ;;  %2829 = vmatprep.mubr.msk.bf16.mxu0 %vm3179_vm0, %v5293_v0  ;;  %v34_v2 = vld [vmem:[%s5285_s0] sm:$0xff]  ;;  %v3244_v4 = vld [vmem:[%s5284_s3 + $0x30] sm:$0xff]  }
   0x2   :  { %2833 = vmatprep.subr.bf16.mxu1 %v5293_v0  ;;  %2849 = vmatprep.mubr.msk.bf16.mxu1 %vm3179_vm0, %v5293_v0  ;;  %v2570_v3 = vcombine.low %v34_v2, %v34_v2  ;;  %v3249_v5 = vld [vmem:[%s5285_s0 + $0x8] sm:$0xff]  ;;  %v3257_v7 = vcombine.high %v34_v2, %v34_v2  ;;  %v3288_v13 = vld [vmem:[%s5284_s3 + $0x20] sm:$0xff]   ;;  %v3301_v14 = vld [vmem:[%s5284_s3 + $0x18] sm:$0xff]  }
   0x3   :  { %2814 = vmatpush3.bf16.msra.mxu0 %v3230_v1  ;;  %2834 = vmatpush3.bf16.msra.mxu1 %v3230_v1  ;;  %v2572_v6 = vcombine.low %v3249_v5, %v3249_v5  ;;  %v3262_v8 = vcombine.high %v3249_v5, %v3249_v5  ;;  %v3268_v9 = vld [vmem:[%s5284_s3 + $0x28] sm:$0xff]   ;;  %v3310_v15 = vld [vmem:[%s5284_s3 + $0x10] sm:$0xff]   ;;  %v3328_v17 = vld [vmem:[%s5284_s3] sm:$0xff]  }
   0x4   :  { %2815 = vmatprep.subr.bf16.mxu0 %v5293_v0  ;;  %2835 = vmatprep.subr.bf16.mxu1 %v5293_v0  ;;  %v37_v10 = vld [vmem:[%s5286_s1 + $0x8] sm:$0xff]  ;;  %v36_v18 = vld [vmem:[%s5286_s1] sm:$0xff]  ;;  %v3355_v20 = vld [vmem:[%s5286_s1 + $0x10] sm:$0xff] }
   0x5   :  { %206 = vrot.lane.b32.xlu0 %v2570_v3, %s3180_s13  ;;  %299 = vrot.lane.b32.xlu1 %v2572_v6, %s3180_s13  ;;  %v3280_v11 = vcombine.high %v37_v10, %v37_v10  ;;  %v3282_v12 = vcombine.low %v37_v10, %v37_v10  ;;  %v3319_v16 = vld [vmem:[%s5284_s3 + $0x8] sm:$0xff]   ;;  %v3346_v19 = vcombine.high %v36_v18, %v36_v18  ;;  %v3417_v26 = vld [vmem:[%s5287_s4 + $0x174] ss:$8 sps:$4 sm:$0xff]  }
   0x6   :  { %v3359_v21 = vcombine.low %v3355_v20, %v3355_v20  ;;  %v3378_v22 = vcombine.low %v36_v18, %v36_v18  ;;  %v3427_v27 = vld [vmem:[%s5287_s4 + $0x170] ss:$8 sps:$4 sm:$0xff]   ;;  %v3433_v28 = vld [vmem:[%s5287_s4 + $0x164] ss:$8 sps:$4 sm:$0xff]   ;;  %v3442_v29 = vld [vmem:[%s5287_s4 + $0x160] ss:$8 sps:$4 sm:$0xff]   ;;  %v3542_v45 = vcombine.high %v3355_v20, %v3355_v20 }
   0x7   :  { %2816 = vmatpush3.bf16.msra.mxu0 %v3244_v4  ;;  %2836 = vmatpush3.bf16.msra.mxu1 %v3244_v4  ;;  %5368 = vst [vmem:[#allocation2_spill] sm:$0xff] %v3280_v11  ;;  %5369 = vst [vmem:[#allocation3_spill] sm:$0xff] %v3282_v12  ;;  %v3448_v30 = vld [vmem:[%s5287_s4 + $0x154] ss:$8 sps:$4 sm:$0xff]   ;;  %v3458_v31 = vld [vmem:[%s5287_s4 + $0x150] ss:$8 sps:$4 sm:$0xff]  }
   0x8   :  { %2817 = vmatprep.subr.bf16.mxu0 %v5293_v0  ;;  %2837 = vmatprep.subr.bf16.mxu1 %v5293_v0  ;;  %5370 = vst [vmem:[#allocation4_spill] sm:$0xff] %v3359_v21  ;;  %v3464_v32 = vld [vmem:[%s5287_s4 + $0x144] ss:$8 sps:$4 sm:$0xff]   ;;  %v3472_v33 = vld [vmem:[%s5287_s4 + $0x140] ss:$8 sps:$4 sm:$0xff]   ;;  %5371 = vst [vmem:[#allocation5_spill] sm:$0xff] %v3542_v45 }
   0x9   :  { %208 = vrot.lane.b32.xlu0 %v3257_v7, %s3180_s13  ;;  %387 = vrot.lane.b32.xlu1 %v3262_v8, %s3180_s13  ;;  %v3478_v34 = vld [vmem:[%s5287_s4 + $0x134] ss:$8 sps:$4 sm:$0xff]   ;;  %v3486_v35 = vld [vmem:[%s5287_s4 + $0x130] ss:$8 sps:$4 sm:$0xff]  }
   0xa   :  { %v3492_v36 = vld [vmem:[%s5287_s4 + $0x124] ss:$8 sps:$4 sm:$0xff]   ;;  %v3500_v37 = vld [vmem:[%s5287_s4 + $0x120] ss:$8 sps:$4 sm:$0xff]   ;;  %v3506_v38 = vld [vmem:[%s5287_s4 + $0x114] ss:$8 sps:$4 sm:$0xff]  }
   0xb   :  { %2818 = vmatpush3.bf16.msra.mxu0 %v3268_v9  ;;  %2838 = vmatpush3.bf16.msra.mxu1 %v3268_v9  ;;  %v3514_v39 = vld [vmem:[%s5287_s4 + $0x110] ss:$8 sps:$4 sm:$0xff]   ;;  %v3520_v40 = vld [vmem:[%s5287_s4 + $0x104] ss:$8 sps:$4 sm:$0xff]   ;;  %v3528_v42 = vld [vmem:[%s5287_s4 + $0x100] ss:$8 sps:$4 sm:$0xff]  }
   0xc   :  { %2819 = vmatprep.subr.bf16.mxu0 %v5293_v0  ;;  %2839 = vmatprep.subr.bf16.mxu1 %v5293_v0  ;;  %v3535_v44 = vld [vmem:[%s5287_s4 + $0x1b4] ss:$8 sps:$4 sm:$0xff]   ;;  %v3549_v46 = vld [vmem:[%s5287_s4 + $0x1b0] ss:$8 sps:$4 sm:$0xff]   ;;  %v3555_v47 = vld [vmem:[%s5287_s4 + $0x1a4] ss:$8 sps:$4 sm:$0xff]  }
   0xd   :  { %865 = vrot.lane.b32.xlu0 %v3282_v12, %s3180_s13  ;;  %867 = vrot.lane.b32.xlu1 %v3280_v11, %s3180_s13  ;;  %v3565_v48 = vld [vmem:[%s5287_s4 + $0x1a0] ss:$8 sps:$4 sm:$0xff]   ;;  %v3571_v49 = vld [vmem:[%s5287_s4 + $0x194] ss:$8 sps:$4 sm:$0xff]  }
   0xe   :  { %v3579_v50 = vld [vmem:[%s5287_s4 + $0x190] ss:$8 sps:$4 sm:$0xff]   ;;  %v3585_v51 = vld [vmem:[%s5287_s4 + $0x184] ss:$8 sps:$4 sm:$0xff]   ;;  %v3593_v52 = vld [vmem:[%s5287_s4 + $0x180] ss:$8 sps:$4 sm:$0xff]  }
   0xf   :  { %2820 = vmatpush3.bf16.msra.mxu0 %v3288_v13  ;;  %2840 = vmatpush3.bf16.msra.mxu1 %v3288_v13  ;;  %v3615_v55 = vld [vmem:[%s5287_s4 + $0x74] ss:$8 sps:$4 sm:$0xff]   ;;  %v3622_v56 = vld [vmem:[%s5287_s4 + $0x70] ss:$8 sps:$4 sm:$0xff]   ;;  %v3629_v57 = vld [vmem:[%s5287_s4 + $0x64] ss:$8 sps:$4 sm:$0xff]  }
  0x10   :  { %2821 = vmatprep.subr.bf16.mxu0 %v5293_v0  ;;  %2841 = vmatprep.subr.bf16.mxu1 %v5293_v0  ;;  %v3637_v59 = vld [vmem:[%s5287_s4 + $0x60] ss:$8 sps:$4 sm:$0xff]   ;;  %v3645_v60 = vld [vmem:[%s5287_s4 + $0x54] ss:$8 sps:$4 sm:$0xff]   ;;  %v3652_v61 = vld [vmem:[%s5287_s4 + $0x50] ss:$8 sps:$4 sm:$0xff]  }
  0x11   :  { %863 = vrot.lane.b32.xlu0 %v3346_v19, %s3180_s13  ;;  %861 = vrot.lane.b32.xlu1 %v3378_v22, %s3180_s13  ;;  %v3659_v62 = vld [vmem:[%s5287_s4 + $0x44] ss:$8 sps:$4 sm:$0xff]   ;;  %v3666_v63 = vld [vmem:[%s5287_s4 + $0x40] ss:$8 sps:$4 sm:$0xff]  }
  0x12   :  { %v3687_v3 = vld [vmem:[%s5287_s4 + $0x24] ss:$8 sps:$4 sm:$0xff]   ;;  %v3708_v6 = vld [vmem:[%s5287_s4 + $0x10] ss:$8 sps:$4 sm:$0xff]  }
  0x13   :  { %2822 = vmatpush3.bf16.msra.mxu0 %v3301_v14  ;;  %2842 = vmatpush3.bf16.msra.mxu1 %v3301_v14  ;;  %v3736_v10 = vld [vmem:[%s5287_s4 + $0xf0] ss:$8 sps:$4 sm:$0xff]  }
  0x14   :  { %2823 = vmatprep.subr.bf16.mxu0 %v5293_v0  ;;  %2843 = vmatprep.subr.bf16.mxu1 %v5293_v0  ;;  %v3768_v18 = vld [vmem:[%s5287_s4 + $0xd0] ss:$8 sps:$4 sm:$0xff]  }
  0x15   :  { %1053 = vrot.lane.b32.xlu0 %v3359_v21, %s3180_s13  ;;  %1234 = vrot.lane.b32.xlu1 %v3542_v45, %s3180_s13  ;;  %v3835_v45 = vld [vmem:[%s5287_s4 + $0x84] ss:$8 sps:$4 sm:$0xff]  }
  0x16   :  { %5376 = vst [vmem:[#allocation10_spill] sm:$0xff] %v3835_v45 }
  0x17   :  { %2824 = vmatpush3.bf16.msra.mxu0 %v3310_v15  ;;  %2844 = vmatpush3.bf16.msra.mxu1 %v3310_v15 }
  0x18   :  { %2825 = vmatprep.subr.bf16.mxu0 %v5293_v0  ;;  %2845 = vmatprep.subr.bf16.mxu1 %v5293_v0 }
  0x1b   :  { %2826 = vmatpush3.bf16.msra.mxu0 %v3319_v16  ;;  %2846 = vmatpush3.bf16.msra.mxu1 %v3319_v16 }
  0x1c   :  { %2827 = vmatprep.subr.bf16.mxu0 %v5293_v0  ;;  %2847 = vmatprep.subr.bf16.mxu1 %v5293_v0 }
  0x1f   :  { %2828 = vmatpush3.bf16.msra.mxu0 %v3328_v17  ;;  %2848 = vmatpush3.bf16.msra.mxu1 %v3328_v17 }
  0x20   :  { %2853 = vmatprep.subr.bf16.mxu0 %v5293_v0  ;;  %2873 = vmatprep.subr.bf16.mxu1 %v5293_v0 }
  0x22   :  { %2830 = vmatmul.mubr.bf16.vlgmr.msra.gmra.mxu0 %v34_v2  ;;  %v3680_v2 = vld [vmem:[%s5287_s4 + $0x30] ss:$8 sps:$4 sm:$0xff]  }
  0x23   :  { %2854 = vmatpush3.bf16.msra.mxu0 %v3230_v1  ;;  %2869 = vmatprep.mubr.msk.bf16.mxu0 %vm3179_vm0, %v5293_v0 }
  0x24   :  { %2855 = vmatprep.subr.bf16.mxu0 %v5293_v0 }
  0x27   :  { %2856 = vmatpush3.bf16.msra.mxu0 %v3244_v4 }
  0x28   :  { %2857 = vmatprep.subr.bf16.mxu0 %v5293_v0 }
  0x2b   :  { %2858 = vmatpush3.bf16.msra.mxu0 %v3268_v9 }
  0x2c   :  { %2859 = vmatprep.subr.bf16.mxu0 %v5293_v0 }
  0x2f   :  { %2860 = vmatpush3.bf16.msra.mxu0 %v3288_v13 }
  0x30   :  { %2861 = vmatprep.subr.bf16.mxu0 %v5293_v0 }
  0x33   :  { %2862 = vmatpush3.bf16.msra.mxu0 %v3301_v14 }
  0x34   :  { %2863 = vmatprep.subr.bf16.mxu0 %v5293_v0 }
  0x37   :  { %2864 = vmatpush3.bf16.msra.mxu0 %v3310_v15 }
  0x38   :  { %2865 = vmatprep.subr.bf16.mxu0 %v5293_v0 }
  0x3b   :  { %2866 = vmatpush3.bf16.msra.mxu0 %v3319_v16 }
  0x3c   :  { %2867 = vmatprep.subr.bf16.mxu0 %v5293_v0 }
  0x3f   :  { %2868 = vmatpush3.bf16.msra.mxu0 %v3328_v17 }
  0x40   :  { %2893 = vmatprep.subr.bf16.mxu0 %v5293_v0 }
  0x42   :  { %2870 = vmatmul.mubr.bf16.vlgmr.msra.gmra.mxu0 %v3257_v7  ;;  %v3715_v7 = vld [vmem:[%s5287_s4 + $0x4] ss:$8 sps:$4 sm:$0xff]  }
  0x43   :  { %2894 = vmatpush3.bf16.msra.mxu0 %v3230_v1  ;;  %2909 = vmatprep.mubr.msk.bf16.mxu0 %vm3179_vm0, %v5293_v0 }
  0x44   :  { %2895 = vmatprep.subr.bf16.mxu0 %v5293_v0 }
  0x47   :  { %2896 = vmatpush3.bf16.msra.mxu0 %v3244_v4 }
  0x48   :  { %2897 = vmatprep.subr.bf16.mxu0 %v5293_v0 }
  0x4b   :  { %2898 = vmatpush3.bf16.msra.mxu0 %v3268_v9 }
  0x4c   :  { %2899 = vmatprep.subr.bf16.mxu0 %v5293_v0 }
  0x4f   :  { %2900 = vmatpush3.bf16.msra.mxu0 %v3288_v13 }
  0x50   :  { %2901 = vmatprep.subr.bf16.mxu0 %v5293_v0 }
  0x53   :  { %2902 = vmatpush3.bf16.msra.mxu0 %v3301_v14 }
  0x54   :  { %2903 = vmatprep.subr.bf16.mxu0 %v5293_v0 }
  0x57   :  { %2904 = vmatpush3.bf16.msra.mxu0 %v3310_v15 }
  0x58   :  { %2905 = vmatprep.subr.bf16.mxu0 %v5293_v0 }
  0x5b   :  { %2906 = vmatpush3.bf16.msra.mxu0 %v3319_v16 }
  0x5c   :  { %2907 = vmatprep.subr.bf16.mxu0 %v5293_v0 }
  0x5f   :  { %2908 = vmatpush3.bf16.msra.mxu0 %v3328_v17 }
  0x60   :  { %2933 = vmatprep.subr.bf16.mxu0 %v5293_v0 }
  0x62   :  { %2910 = vmatmul.mubr.bf16.vlgmr.msra.gmra.mxu0 %v3249_v5  ;;  %v3701_v5 = vld [vmem:[%s5287_s4 + $0x14] ss:$8 sps:$4 sm:$0xff]  }
  0x63   :  { %2934 = vmatpush3.bf16.msra.mxu0 %v3230_v1  ;;  %2949 = vmatprep.mubr.msk.bf16.mxu0 %vm3179_vm0, %v5293_v0 }
  0x64   :  { %2935 = vmatprep.subr.bf16.mxu0 %v5293_v0 }
  0x67   :  { %2936 = vmatpush3.bf16.msra.mxu0 %v3244_v4 }
  0x68   :  { %2937 = vmatprep.subr.bf16.mxu0 %v5293_v0 }
  0x6b   :  { %2938 = vmatpush3.bf16.msra.mxu0 %v3268_v9 }
  0x6c   :  { %2939 = vmatprep.subr.bf16.mxu0 %v5293_v0 }
  0x6f   :  { %2940 = vmatpush3.bf16.msra.mxu0 %v3288_v13 }
  0x70   :  { %2941 = vmatprep.subr.bf16.mxu0 %v5293_v0 }
  0x73   :  { %2942 = vmatpush3.bf16.msra.mxu0 %v3301_v14 }
  0x74   :  { %2943 = vmatprep.subr.bf16.mxu0 %v5293_v0 }
  0x77   :  { %v207_v23 = vpop.permute.xlu0 %206  ;;  %2944 = vmatpush3.bf16.msra.mxu0 %v3310_v15  ;;  %v300_v41 = vpop.permute.xlu1 %299 }
  0x78   :  { %2945 = vmatprep.subr.bf16.mxu0 %v5293_v0 }
  0x7b   :  { %v209_v24 = vpop.permute.xlu0 %208  ;;  %2946 = vmatpush3.bf16.msra.mxu0 %v3319_v16  ;;  %v388_v53 = vpop.permute.xlu1 %387 }
  0x7c   :  { %v211_v25 = vsel %vm210_vm1, %v207_v23, %v209_v24  ;;  %2947 = vmatprep.subr.bf16.mxu0 %v5293_v0  ;;  %v301_v43 = vsel %vm210_vm1, %v209_v24, %v300_v41  ;;  %v389_v58 = vsel %vm210_vm1, %v300_v41, %v388_v53  ;;  %v3778_v23 = vld [vmem:[%s5287_s4 + $0xc4] ss:$8 sps:$4 sm:$0xff]  }
  0x7d   :  { %2850 = vmatmul.mubr.bf16.vlgmr.msra.gmra.mxu1 %v211_v25  ;;  %v3786_v25 = vld [vmem:[%s5287_s4 + $0xc0] ss:$8 sps:$4 sm:$0xff]  }
  0x7e   :  { %2874 = vmatpush3.bf16.msra.mxu1 %v3230_v1  ;;  %2889 = vmatprep.mubr.msk.bf16.mxu1 %vm3179_vm0, %v5293_v0 }
  0x7f   :  { %2875 = vmatprep.subr.bf16.mxu1 %v5293_v0  ;;  %2948 = vmatpush3.bf16.msra.mxu0 %v3328_v17  ;;  %v3600_v54 = vpop.permute.xlu1 %867 }
  0x80   :  { %820 = vmatprep.subr.bf16.mxu0 %v3417_v26  ;;  %5372 = vst [vmem:[#allocation6_spill] sm:$0xff] %v3600_v54 }
  0x82   :  { %2876 = vmatpush3.bf16.msra.mxu1 %v3244_v4  ;;  %2950 = vmatmul.mubr.bf16.vlgmr.msra.gmra.mxu0 %v3262_v8  ;;  %v3722_v8 = vld [vmem:[%s5287_s4] ss:$8 sps:$4 sm:$0xff]  }
  0x83   :  { %2877 = vmatprep.subr.bf16.mxu1 %v5293_v0  ;;  %821 = vmatpush1.bf16.msra.mxu0 %v3427_v27 }
  0x84   :  { %822 = vmatprep.subr.bf16.mxu0 %v3433_v28  ;;  %2635 = vmatprep.mubr.msk.bf16.mxu0 %vm210_vm1, %v3280_v11 }
  0x86   :  { %2878 = vmatpush3.bf16.msra.mxu1 %v3268_v9 }
  0x87   :  { %2879 = vmatprep.subr.bf16.mxu1 %v5293_v0  ;;  %823 = vmatpush1.bf16.msra.mxu0 %v3442_v29 }
  0x88   :  { %824 = vmatprep.subr.bf16.mxu0 %v3448_v30 }
  0x8a   :  { %2880 = vmatpush3.bf16.msra.mxu1 %v3288_v13 }
  0x8b   :  { %2881 = vmatprep.subr.bf16.mxu1 %v5293_v0  ;;  %825 = vmatpush1.bf16.msra.mxu0 %v3458_v31 }
  0x8c   :  { %826 = vmatprep.subr.bf16.mxu0 %v3464_v32 }
  0x8e   :  { %2882 = vmatpush3.bf16.msra.mxu1 %v3301_v14 }
  0x8f   :  { %2883 = vmatprep.subr.bf16.mxu1 %v5293_v0  ;;  %827 = vmatpush1.bf16.msra.mxu0 %v3472_v33 }
  0x90   :  { %828 = vmatprep.subr.bf16.mxu0 %v3478_v34 }
  0x92   :  { %2884 = vmatpush3.bf16.msra.mxu1 %v3310_v15 }
  0x93   :  { %2885 = vmatprep.subr.bf16.mxu1 %v5293_v0  ;;  %829 = vmatpush1.bf16.msra.mxu0 %v3486_v35 }
  0x94   :  { %830 = vmatprep.subr.bf16.mxu0 %v3492_v36 }
  0x96   :  { %2886 = vmatpush3.bf16.msra.mxu1 %v3319_v16 }
  0x97   :  { %2887 = vmatprep.subr.bf16.mxu1 %v5293_v0  ;;  %831 = vmatpush1.bf16.msra.mxu0 %v3500_v37 }
  0x98   :  { %832 = vmatprep.subr.bf16.mxu0 %v3506_v38 }
  0x9a   :  { %2888 = vmatpush3.bf16.msra.mxu1 %v3328_v17 }
  0x9b   :  { %2913 = vmatprep.subr.bf16.mxu1 %v5293_v0  ;;  %833 = vmatpush1.bf16.msra.mxu0 %v3514_v39 }
  0x9c   :  { %834 = vmatprep.subr.bf16.mxu0 %v3520_v40 }
  0x9d   :  { %2890 = vmatmul.mubr.bf16.vlgmr.msra.gmra.mxu1 %v301_v43  ;;  %v3793_v43 = vld [vmem:[%s5287_s4 + $0xb4] ss:$8 sps:$4 sm:$0xff]  }
  0x9e   :  { %2914 = vmatpush3.bf16.msra.mxu1 %v3230_v1  ;;  %2929 = vmatprep.mubr.msk.bf16.mxu1 %vm3179_vm0, %v5293_v0  ;;  %v3673_v1 = vld [vmem:[%s5287_s4 + $0x34] ss:$8 sps:$4 sm:$0xff]  }
  0x9f   :  { %2915 = vmatprep.subr.bf16.mxu1 %v5293_v0  ;;  %835 = vmatpush1.bf16.msra.mxu0 %v3528_v42 }
  0xa0   :  { %844 = vmatprep.subr.bf16.mxu0 %v3535_v44 }
  0xa2   :  { %2916 = vmatpush3.bf16.msra.mxu1 %v3244_v4  ;;  %v3694_v4 = vld [vmem:[%s5287_s4 + $0x20] ss:$8 sps:$4 sm:$0xff]  }
  0xa3   :  { %2917 = vmatprep.subr.bf16.mxu1 %v5293_v0  ;;  %845 = vmatpush2.bf16.msra.mxu0 %v3549_v46 }
  0xa4   :  { %846 = vmatprep.subr.bf16.mxu0 %v3555_v47 }
  0xa6   :  { %2918 = vmatpush3.bf16.msra.mxu1 %v3268_v9  ;;  %v3729_v9 = vld [vmem:[%s5287_s4 + $0xf4] ss:$8 sps:$4 sm:$0xff]  }
  0xa7   :  { %2919 = vmatprep.subr.bf16.mxu1 %v5293_v0  ;;  %847 = vmatpush2.bf16.msra.mxu0 %v3565_v48 }
  0xa8   :  { %848 = vmatprep.subr.bf16.mxu0 %v3571_v49 }
  0xaa   :  { %2920 = vmatpush3.bf16.msra.mxu1 %v3288_v13  ;;  %v3743_v13 = vld [vmem:[%s5287_s4 + $0xe4] ss:$8 sps:$4 sm:$0xff]  }
  0xab   :  { %2921 = vmatprep.subr.bf16.mxu1 %v5293_v0  ;;  %849 = vmatpush2.bf16.msra.mxu0 %v3579_v50  ;;  %5373 = vst [vmem:[#allocation7_spill] sm:$0xff] %v3743_v13 }
  0xac   :  { %850 = vmatprep.subr.bf16.mxu0 %v3585_v51 }
  0xae   :  { %2922 = vmatpush3.bf16.msra.mxu1 %v3301_v14  ;;  %v866_v14 = vpop.permute.xlu0 %865 }
  0xaf   :  { %2923 = vmatprep.subr.bf16.mxu1 %v5293_v0  ;;  %851 = vmatpush2.bf16.msra.mxu0 %v3593_v52 }
  0xb0   :  { %919 = vmatprep.subr.bf16.mxu0 %v3417_v26 }
  0xb2   :  { %2924 = vmatpush3.bf16.msra.mxu1 %v3310_v15  ;;  %853 = vmatmul.mubr.bf16.vlgmr.msra.gmra.mxu0 %v3282_v12  ;;  %v3750_v15 = vld [vmem:[%s5287_s4 + $0xe0] ss:$8 sps:$4 sm:$0xff]  }
  0xb3   :  { %2925 = vmatprep.subr.bf16.mxu1 %v5293_v0  ;;  %920 = vmatpush1.bf16.msra.mxu0 %v3427_v27 }
  0xb4   :  { %921 = vmatprep.subr.bf16.mxu0 %v3433_v28  ;;  %2636 = vmatprep.mubr.msk.bf16.mxu0 %vm210_vm1, %v3600_v54 }
  0xb6   :  { %2926 = vmatpush3.bf16.msra.mxu1 %v3319_v16  ;;  %v3756_v16 = vsel %vm210_vm1, %v866_v14, %v3600_v54 }
  0xb7   :  { %2927 = vmatprep.subr.bf16.mxu1 %v5293_v0  ;;  %922 = vmatpush1.bf16.msra.mxu0 %v3442_v29  ;;  %5374 = vst [vmem:[#allocation8_spill] sm:$0xff] %v3756_v16  ;;  %v3828_v0 = vld [vmem:[%s5287_s4 + $0x90] ss:$8 sps:$4 sm:$0xff]  }
  0xb8   :  { %923 = vmatprep.subr.bf16.mxu0 %v3448_v30  ;;  %5375 = vst [vmem:[#allocation9_spill] sm:$0xff] %v3828_v0 }
  0xba   :  { %2928 = vmatpush3.bf16.msra.mxu1 %v3328_v17  ;;  %v3761_v17 = vld [vmem:[%s5287_s4 + $0xd4] ss:$8 sps:$4 sm:$0xff]  }
  0xbb   :  { %779 = vmatprep.subr.bf16.mxu1 %v3615_v55  ;;  %924 = vmatpush1.bf16.msra.mxu0 %v3458_v31 }
  0xbc   :  { %925 = vmatprep.subr.bf16.mxu0 %v3464_v32 }
  0xbd   :  { %2930 = vmatmul.mubr.bf16.vlgmr.msra.gmra.mxu1 %v389_v58  ;;  %v3800_v58 = vld [vmem:[%s5287_s4 + $0xb0] ss:$8 sps:$4 sm:$0xff]  }
  0xbe   :  { %780 = vmatpush1.bf16.msra.mxu1 %v3622_v56  ;;  %811 = vmatprep.mubr.bf16.mxu1 %v3346_v19 }
  0xbf   :  { %781 = vmatprep.subr.bf16.mxu1 %v3629_v57  ;;  %926 = vmatpush1.bf16.msra.mxu0 %v3472_v33 }
  0xc0   :  { %927 = vmatprep.subr.bf16.mxu0 %v3478_v34 }
  0xc2   :  { %782 = vmatpush1.bf16.msra.mxu1 %v3637_v59 }
  0xc3   :  { %783 = vmatprep.subr.bf16.mxu1 %v3645_v60  ;;  %928 = vmatpush1.bf16.msra.mxu0 %v3486_v35 }
  0xc4   :  { %929 = vmatprep.subr.bf16.mxu0 %v3492_v36 }
  0xc6   :  { %784 = vmatpush1.bf16.msra.mxu1 %v3652_v61 }
  0xc7   :  { %785 = vmatprep.subr.bf16.mxu1 %v3659_v62  ;;  %930 = vmatpush1.bf16.msra.mxu0 %v3500_v37 }
  0xc8   :  { %931 = vmatprep.subr.bf16.mxu0 %v3506_v38 }
  0xca   :  { %786 = vmatpush1.bf16.msra.mxu1 %v3666_v63 }
  0xcb   :  { %787 = vmatprep.subr.bf16.mxu1 %v3673_v1  ;;  %932 = vmatpush1.bf16.msra.mxu0 %v3514_v39 }
  0xcc   :  { %933 = vmatprep.subr.bf16.mxu0 %v3520_v40 }
  0xce   :  { %788 = vmatpush1.bf16.msra.mxu1 %v3680_v2 }
  0xcf   :  { %789 = vmatprep.subr.bf16.mxu1 %v3687_v3  ;;  %934 = vmatpush1.bf16.msra.mxu0 %v3528_v42 }
  0xd0   :  { %943 = vmatprep.subr.bf16.mxu0 %v3535_v44 }
  0xd2   :  { %790 = vmatpush1.bf16.msra.mxu1 %v3694_v4 }
  0xd3   :  { %791 = vmatprep.subr.bf16.mxu1 %v3701_v5  ;;  %944 = vmatpush2.bf16.msra.mxu0 %v3549_v46 }
  0xd4   :  { %945 = vmatprep.subr.bf16.mxu0 %v3555_v47 }
  0xd6   :  { %792 = vmatpush1.bf16.msra.mxu1 %v3708_v6 }
  0xd7   :  { %793 = vmatprep.subr.bf16.mxu1 %v3715_v7  ;;  %946 = vmatpush2.bf16.msra.mxu0 %v3565_v48 }
  0xd8   :  { %947 = vmatprep.subr.bf16.mxu0 %v3571_v49 }
  0xda   :  { %794 = vmatpush1.bf16.msra.mxu1 %v3722_v8 }
  0xdb   :  { %795 = vmatprep.subr.bf16.mxu1 %v3729_v9  ;;  %948 = vmatpush2.bf16.msra.mxu0 %v3579_v50 }
  0xdc   :  { %949 = vmatprep.subr.bf16.mxu0 %v3585_v51 }
  0xde   :  { %796 = vmatpush2.bf16.msra.mxu1 %v3736_v10 }
  0xdf   :  { %797 = vmatprep.subr.bf16.mxu1 %v3743_v13  ;;  %950 = vmatpush2.bf16.msra.mxu0 %v3593_v52 }
  0xe0   :  { %969 = vmatprep.subr.bf16.mxu0 %v3615_v55 }
  0xe2   :  { %798 = vmatpush2.bf16.msra.mxu1 %v3750_v15  ;;  %952 = vmatmul.mubr.bf16.vlgmr.msra.gmra.mxu0 %v3756_v16  ;;  %v3771_v20 = vpop.f32.mrf.mxu0  ;;  %v3848_v16 = vpop.permute.xlu0 %863 }
  0xe3   :  { %799 = vmatprep.subr.bf16.mxu1 %v3761_v17  ;;  %970 = vmatpush1.bf16.msra.mxu0 %v3622_v56  ;;  %v3854_v11 = vsel %vm210_vm1, %v3848_v16, %v866_v14 }
  0xe4   :  { %971 = vmatprep.subr.bf16.mxu0 %v3629_v57  ;;  %v2831_v24 = vpop.f32.mrf.mxu0  ;;  %1001 = vmatprep.mubr.bf16.mxu0 %v3282_v12  ;;  %v3842_v12 = vld [vmem:[%s5287_s4 + $0x80] ss:$8 sps:$4 sm:$0xff]   ;;  %5377 = vst [vmem:[#allocation11_spill] sm:$0xff] %v3854_v11 }
  0xe5   :  { %v3807_v24 = vld [vmem:[%s5287_s4 + $0xa4] ss:$8 sps:$4 sm:$0xff]  }
  0xe6   :  { %800 = vmatpush2.bf16.msra.mxu1 %v3768_v18  ;;  %v198_v41 = vpop.f32.mrf.mxu0 }
  0xe7   :  { %801 = vmatprep.subr.bf16.mxu1 %v3778_v23  ;;  %972 = vmatpush1.bf16.msra.mxu0 %v3637_v59  ;;  %v3814_v41 = vld [vmem:[%s5287_s4 + $0xa0] ss:$8 sps:$4 sm:$0xff]  }
  0xe8   :  { %973 = vmatprep.subr.bf16.mxu0 %v3645_v60  ;;  %v2832_v53 = vpop.f32.mrf.mxu0 }
  0xe9   :  { %v3821_v53 = vld [vmem:[%s5287_s4 + $0x94] ss:$8 sps:$4 sm:$0xff]  }
  0xea   :  { %802 = vmatpush2.bf16.msra.mxu1 %v3786_v25 }
  0xeb   :  { %803 = vmatprep.subr.bf16.mxu1 %v3793_v43  ;;  %974 = vmatpush1.bf16.msra.mxu0 %v3652_v61 }
  0xec   :  { %975 = vmatprep.subr.bf16.mxu0 %v3659_v62 }
  0xee   :  { %804 = vmatpush2.bf16.msra.mxu1 %v3800_v58 }
  0xef   :  { %805 = vmatprep.subr.bf16.mxu1 %v3807_v24  ;;  %976 = vmatpush1.bf16.msra.mxu0 %v3666_v63 }
  0xf0   :  { %977 = vmatprep.subr.bf16.mxu0 %v3673_v1 }
  0xf2   :  { %806 = vmatpush2.bf16.msra.mxu1 %v3814_v41 }
  0xf3   :  { %807 = vmatprep.subr.bf16.mxu1 %v3821_v53  ;;  %978 = vmatpush1.bf16.msra.mxu0 %v3680_v2 }
  0xf4   :  { %979 = vmatprep.subr.bf16.mxu0 %v3687_v3 }
  0xf6   :  { %808 = vmatpush2.bf16.msra.mxu1 %v3828_v0 }
  0xf7   :  { %809 = vmatprep.subr.bf16.mxu1 %v3835_v45  ;;  %980 = vmatpush1.bf16.msra.mxu0 %v3694_v4 }
  0xf8   :  { %981 = vmatprep.subr.bf16.mxu0 %v3701_v5 }
  0xfa   :  { %810 = vmatpush2.bf16.msra.mxu1 %v3842_v12 }
  0xfb   :  { %878 = vmatprep.subr.bf16.mxu1 %v3615_v55  ;;  %982 = vmatpush1.bf16.msra.mxu0 %v3708_v6 }
  0xfc   :  { %983 = vmatprep.subr.bf16.mxu0 %v3715_v7 }
  0xfd   :  { %812 = vmatmul.mubr.bf16.vlgmr.msra.gmra.mxu1 %v3378_v22 }
  0xfe   :  { %879 = vmatpush1.bf16.msra.mxu1 %v3622_v56  ;;  %910 = vmatprep.mubr.bf16.mxu1 %v3854_v11 }
  0xff   :  { %880 = vmatprep.subr.bf16.mxu1 %v3629_v57  ;;  %984 = vmatpush1.bf16.msra.mxu0 %v3722_v8 }
 0x100   :  { %985 = vmatprep.subr.bf16.mxu0 %v3729_v9 }
 0x102   :  { %881 = vmatpush1.bf16.msra.mxu1 %v3637_v59  ;;  %v3864_v54 = vpop.f32.mrf.mxu0 }
 0x103   :  { %882 = vmatprep.subr.bf16.mxu1 %v3645_v60  ;;  %986 = vmatpush2.bf16.msra.mxu0 %v3736_v10 }
 0x104   :  { %987 = vmatprep.subr.bf16.mxu0 %v3743_v13  ;;  %v2871_v22 = vpop.f32.mrf.mxu0 }
 0x105   :  { %v3880_v22 = vld [vmem:[%s5286_s1 + $0x18] sm:$0xff] }
 0x106   :  { %883 = vmatpush1.bf16.msra.mxu1 %v3652_v61  ;;  %v292_v14 = vpop.f32.mrf.mxu0  ;;  %5378 = vst [vmem:[#allocation12_spill] sm:$0xff] %v3880_v22 }
 0x107   :  { %884 = vmatprep.subr.bf16.mxu1 %v3659_v62  ;;  %988 = vmatpush2.bf16.msra.mxu0 %v3750_v15  ;;  %v3885_v14 = vcombine.low %v3880_v22, %v3880_v22 }
 0x108   :  { %989 = vmatprep.subr.bf16.mxu0 %v3761_v17  ;;  %v2872_v11 = vpop.f32.mrf.mxu0 }
 0x109   :  { %5379 = vst [vmem:[#allocation13_spill] sm:$0xff] %v3885_v14  ;;  %1416 = vrot.lane.b32.xlu0 %v3885_v14, %s3180_s13  ;;  %v3912_v14 = vpop.permute.xlu0 %1053 }
 0x10a   :  { %885 = vmatpush1.bf16.msra.mxu1 %v3666_v63 }
 0x10b   :  { %886 = vmatprep.subr.bf16.mxu1 %v3673_v1  ;;  %990 = vmatpush2.bf16.msra.mxu0 %v3768_v18 }
 0x10c   :  { %991 = vmatprep.subr.bf16.mxu0 %v3778_v23 }
 0x10e   :  { %887 = vmatpush1.bf16.msra.mxu1 %v3680_v2 }
 0x10f   :  { %888 = vmatprep.subr.bf16.mxu1 %v3687_v3  ;;  %992 = vmatpush2.bf16.msra.mxu0 %v3786_v25 }
 0x110   :  { %993 = vmatprep.subr.bf16.mxu0 %v3793_v43 }
 0x112   :  { %889 = vmatpush1.bf16.msra.mxu1 %v3694_v4 }
 0x113   :  { %890 = vmatprep.subr.bf16.mxu1 %v3701_v5  ;;  %994 = vmatpush2.bf16.msra.mxu0 %v3800_v58 }
 0x114   :  { %995 = vmatprep.subr.bf16.mxu0 %v3807_v24 }
 0x116   :  { %891 = vmatpush1.bf16.msra.mxu1 %v3708_v6 }
 0x117   :  { %892 = vmatprep.subr.bf16.mxu1 %v3715_v7  ;;  %996 = vmatpush2.bf16.msra.mxu0 %v3814_v41 }
 0x118   :  { %997 = vmatprep.subr.bf16.mxu0 %v3821_v53 }
 0x11a   :  { %893 = vmatpush1.bf16.msra.mxu1 %v3722_v8 }
 0x11b   :  { %894 = vmatprep.subr.bf16.mxu1 %v3729_v9  ;;  %998 = vmatpush2.bf16.msra.mxu0 %v3828_v0 }
 0x11c   :  { %999 = vmatprep.subr.bf16.mxu0 %v3835_v45 }
 0x11e   :  { %895 = vmatpush2.bf16.msra.mxu1 %v3736_v10 }
 0x11f   :  { %896 = vmatprep.subr.bf16.mxu1 %v3743_v13  ;;  %1000 = vmatpush2.bf16.msra.mxu0 %v3842_v12 }
 0x120   :  { %1101 = vmatprep.subr.bf16.mxu0 %v3417_v26 }
 0x122   :  { %897 = vmatpush2.bf16.msra.mxu1 %v3750_v15  ;;  %1002 = vmatmul.mubr.bf16.vlgmr.msra.gmra.mxu0 %v3346_v19  ;;  %v3910_v11 = vpop.f32.mrf.mxu0 }
 0x123   :  { %898 = vmatprep.subr.bf16.mxu1 %v3761_v17  ;;  %1102 = vmatpush1.bf16.msra.mxu0 %v3427_v27 }
 0x124   :  { %1103 = vmatprep.subr.bf16.mxu0 %v3433_v28  ;;  %2639 = vmatprep.mubr.msk.bf16.mxu0 %vm210_vm1, %v3912_v14  ;;  %v2911_v22 = vpop.f32.mrf.mxu0 }
 0x126   :  { %899 = vmatpush2.bf16.msra.mxu1 %v3768_v18  ;;  %v381_v13 = vpop.f32.mrf.mxu0 }
 0x127   :  { %900 = vmatprep.subr.bf16.mxu1 %v3778_v23  ;;  %1104 = vmatpush1.bf16.msra.mxu0 %v3442_v29  ;;  %v862_v13 = vpop.permute.xlu1 %861 }
 0x128   :  { %1105 = vmatprep.subr.bf16.mxu0 %v3448_v30  ;;  %v2912_v19 = vpop.f32.mrf.mxu0  ;;  %v869_v22 = vsel %vm210_vm1, %v862_v13, %v3848_v16 }
 0x12a   :  { %901 = vmatpush2.bf16.msra.mxu1 %v3786_v25 }
 0x12b   :  { %902 = vmatprep.subr.bf16.mxu1 %v3793_v43  ;;  %1106 = vmatpush1.bf16.msra.mxu0 %v3458_v31 }
 0x12c   :  { %1107 = vmatprep.subr.bf16.mxu0 %v3464_v32 }
 0x12e   :  { %903 = vmatpush2.bf16.msra.mxu1 %v3800_v58 }
 0x12f   :  { %904 = vmatprep.subr.bf16.mxu1 %v3807_v24  ;;  %1108 = vmatpush1.bf16.msra.mxu0 %v3472_v33 }
 0x130   :  { %1109 = vmatprep.subr.bf16.mxu0 %v3478_v34 }
 0x132   :  { %905 = vmatpush2.bf16.msra.mxu1 %v3814_v41 }
 0x133   :  { %906 = vmatprep.subr.bf16.mxu1 %v3821_v53  ;;  %1110 = vmatpush1.bf16.msra.mxu0 %v3486_v35 }
 0x134   :  { %1111 = vmatprep.subr.bf16.mxu0 %v3492_v36 }
 0x136   :  { %907 = vmatpush2.bf16.msra.mxu1 %v3828_v0 }
 0x137   :  { %908 = vmatprep.subr.bf16.mxu1 %v3835_v45  ;;  %1112 = vmatpush1.bf16.msra.mxu0 %v3500_v37 }
 0x138   :  { %1113 = vmatprep.subr.bf16.mxu0 %v3506_v38 }
 0x13a   :  { %909 = vmatpush2.bf16.msra.mxu1 %v3842_v12 }
 0x13b   :  { %1010 = vmatprep.subr.bf16.mxu1 %v3417_v26  ;;  %1114 = vmatpush1.bf16.msra.mxu0 %v3514_v39 }
 0x13c   :  { %1115 = vmatprep.subr.bf16.mxu0 %v3520_v40 }
 0x13d   :  { %911 = vmatmul.mubr.bf16.vlgmr.msra.gmra.mxu1 %v869_v22  ;;  %v247_v19 = vpop.f32.mrf.mxu1 }
 0x13e   :  { %v253_v45 = vmax.f32 %v3771_v20, %v247_v19  ;;  %1011 = vmatpush1.bf16.msra.mxu1 %v3427_v27  ;;  %2638 = vmatprep.mubr.msk.bf16.mxu1 %vm210_vm1, %v3359_v21 }
 0x13f   :  { %v2851_v0 = vpop.f32.mrf.mxu1  ;;  %1012 = vmatprep.subr.bf16.mxu1 %v3433_v28  ;;  %1116 = vmatpush1.bf16.msra.mxu0 %v3528_v42 }
 0x140   :  { %v295_v16 = vmax.f32 %v253_v45, %v3864_v54  ;;  %1125 = vmatprep.subr.bf16.mxu0 %v3535_v44  ;;  %v5380_v54 = vld [vmem:[#allocation6_spill] sm:$0xff] }
 0x141   :  { %v250_v13 = vpop.f32.mrf.mxu1 }
 0x142   :  { %1013 = vmatpush1.bf16.msra.mxu1 %v3442_v29  ;;  %v3954_v22 = vpop.f32.mrf.mxu0  ;;  %v3974_v13 = vsel %vm210_vm1, %v5380_v54, %v3912_v14 }
 0x143   :  { %v2852_v20 = vpop.f32.mrf.mxu1  ;;  %1014 = vmatprep.subr.bf16.mxu1 %v3448_v30  ;;  %1126 = vmatpush2.bf16.msra.mxu0 %v3549_v46  ;;  %5381 = vst [vmem:[#allocation6_spill] sm:$0xff] %v3974_v13 }
 0x144   :  { %1127 = vmatprep.subr.bf16.mxu0 %v3555_v47  ;;  %v2951_v0 = vpop.f32.mrf.mxu0  ;;  %v5382_v20 = vld [vmem:[#allocation2_spill] sm:$0xff] }
 0x146   :  { %1015 = vmatpush1.bf16.msra.mxu1 %v3458_v31  ;;  %v470_v19 = vpop.f32.mrf.mxu0 }
 0x147   :  { %1016 = vmatprep.subr.bf16.mxu1 %v3464_v32  ;;  %1128 = vmatpush2.bf16.msra.mxu0 %v3565_v48 }
 0x148   :  { %1129 = vmatprep.subr.bf16.mxu0 %v3571_v49  ;;  %v2952_v45 = vpop.f32.mrf.mxu0 }
 0x14a   :  { %1017 = vmatpush1.bf16.msra.mxu1 %v3472_v33 }
 0x14b   :  { %1018 = vmatprep.subr.bf16.mxu1 %v3478_v34  ;;  %1130 = vmatpush2.bf16.msra.mxu0 %v3579_v50 }
 0x14c   :  { %1131 = vmatprep.subr.bf16.mxu0 %v3585_v51 }
 0x14e   :  { %1019 = vmatpush1.bf16.msra.mxu1 %v3486_v35 }
 0x14f   :  { %1020 = vmatprep.subr.bf16.mxu1 %v3492_v36  ;;  %1132 = vmatpush2.bf16.msra.mxu0 %v3593_v52 }
 0x150   :  { %1150 = vmatprep.subr.bf16.mxu0 %v3615_v55 }
 0x152   :  { %1021 = vmatpush1.bf16.msra.mxu1 %v3500_v37  ;;  %1134 = vmatmul.mubr.bf16.vlgmr.msra.gmra.mxu0 %v3974_v13 }
 0x153   :  { %1022 = vmatprep.subr.bf16.mxu1 %v3506_v38  ;;  %1151 = vmatpush1.bf16.msra.mxu0 %v3622_v56 }
 0x154   :  { %1152 = vmatprep.subr.bf16.mxu0 %v3629_v57  ;;  %1182 = vmatprep.mubr.bf16.mxu0 %v5382_v20 }
 0x156   :  { %1023 = vmatpush1.bf16.msra.mxu1 %v3514_v39 }
 0x157   :  { %1024 = vmatprep.subr.bf16.mxu1 %v3520_v40  ;;  %1153 = vmatpush1.bf16.msra.mxu0 %v3637_v59 }
 0x158   :  { %1154 = vmatprep.subr.bf16.mxu0 %v3645_v60 }
 0x15a   :  { %1025 = vmatpush1.bf16.msra.mxu1 %v3528_v42 }
 0x15b   :  { %1034 = vmatprep.subr.bf16.mxu1 %v3535_v44  ;;  %1155 = vmatpush1.bf16.msra.mxu0 %v3652_v61 }
 0x15c   :  { %1156 = vmatprep.subr.bf16.mxu0 %v3659_v62 }
 0x15d   :  { %v337_v0 = vpop.f32.mrf.mxu1 }
 0x15e   :  { %v343_v19 = vmax.f32 %v295_v16, %v337_v0  ;;  %1035 = vmatpush2.bf16.msra.mxu1 %v3549_v46  ;;  %v5384_v16 = vld [vmem:[#allocation7_spill] sm:$0xff] }
 0x15f   :  { %v2891_v45 = vpop.f32.mrf.mxu1  ;;  %1036 = vmatprep.subr.bf16.mxu1 %v3555_v47  ;;  %1157 = vmatpush1.bf16.msra.mxu0 %v3666_v63 }
 0x160   :  { %v384_v54 = vmax.f32 %v343_v19, %v3910_v11  ;;  %1158 = vmatprep.subr.bf16.mxu0 %v3673_v1 }
 0x161   :  { %v340_v13 = vpop.f32.mrf.mxu1 }
 0x162   :  { %1037 = vmatpush2.bf16.msra.mxu1 %v3565_v48 }
 0x163   :  { %v2892_v21 = vpop.f32.mrf.mxu1  ;;  %1038 = vmatprep.subr.bf16.mxu1 %v3571_v49  ;;  %1159 = vmatpush1.bf16.msra.mxu0 %v3680_v2 }
 0x164   :  { %1160 = vmatprep.subr.bf16.mxu0 %v3687_v3  ;;  %v5383_v21 = vld [vmem:[#allocation8_spill] sm:$0xff] }
 0x166   :  { %1039 = vmatpush2.bf16.msra.mxu1 %v3579_v50 }
 0x167   :  { %1040 = vmatprep.subr.bf16.mxu1 %v3585_v51  ;;  %1161 = vmatpush1.bf16.msra.mxu0 %v3694_v4 }
 0x168   :  { %1162 = vmatprep.subr.bf16.mxu0 %v3701_v5 }
 0x16a   :  { %1041 = vmatpush2.bf16.msra.mxu1 %v3593_v52 }
 0x16b   :  { %1060 = vmatprep.subr.bf16.mxu1 %v3615_v55  ;;  %1163 = vmatpush1.bf16.msra.mxu0 %v3708_v6 }
 0x16c   :  { %1164 = vmatprep.subr.bf16.mxu0 %v3715_v7 }
 0x16d   :  { %1043 = vmatmul.mubr.bf16.vlgmr.msra.gmra.mxu1 %v5382_v20 }
 0x16e   :  { %1061 = vmatpush1.bf16.msra.mxu1 %v3622_v56  ;;  %1092 = vmatprep.mubr.bf16.mxu1 %v5383_v21 }
 0x16f   :  { %1062 = vmatprep.subr.bf16.mxu1 %v3629_v57  ;;  %1165 = vmatpush1.bf16.msra.mxu0 %v3722_v8 }
 0x170   :  { %1166 = vmatprep.subr.bf16.mxu0 %v3729_v9 }
 0x172   :  { %1063 = vmatpush1.bf16.msra.mxu1 %v3637_v59  ;;  %v4014_v11 = vpop.f32.mrf.mxu0 }
 0x173   :  { %1064 = vmatprep.subr.bf16.mxu1 %v3645_v60  ;;  %1167 = vmatpush2.bf16.msra.mxu0 %v3736_v10 }
 0x174   :  { %1168 = vmatprep.subr.bf16.mxu0 %v5384_v16  ;;  %v4019_v13 = vpop.f32.mrf.mxu0 }
 0x175   :  { %5385 = vst [vmem:[#allocation7_spill] sm:$0xff] %v4019_v13 }
 0x176   :  { %1065 = vmatpush1.bf16.msra.mxu1 %v3652_v61  ;;  %v858_v0 = vpop.f32.mrf.mxu0 }
 0x177   :  { %1066 = vmatprep.subr.bf16.mxu1 %v3659_v62  ;;  %1169 = vmatpush2.bf16.msra.mxu0 %v3750_v15  ;;  %v5386_v0 = vld [vmem:[#allocation12_spill] sm:$0xff] }
 0x178   :  { %1170 = vmatprep.subr.bf16.mxu0 %v3761_v17  ;;  %v859_v19 = vpop.f32.mrf.mxu0  ;;  %v4032_v20 = vcombine.high %v5386_v0, %v5386_v0  ;;  %v4060_v0 = vpop.permute.xlu1 %1234 }
 0x17a   :  { %1067 = vmatpush1.bf16.msra.mxu1 %v3666_v63  ;;  %5387 = vst [vmem:[#allocation12_spill] sm:$0xff] %v4032_v20  ;;  %1597 = vrot.lane.b32.xlu1 %v4032_v20, %s3180_s13  ;;  %v5392_v20 = vld [vmem:[#allocation11_spill] sm:$0xff] }
 0x17b   :  { %1068 = vmatprep.subr.bf16.mxu1 %v3673_v1  ;;  %1171 = vmatpush2.bf16.msra.mxu0 %v3768_v18 }
 0x17c   :  { %1172 = vmatprep.subr.bf16.mxu0 %v3778_v23 }
 0x17d   :  { %v425_v45 = vpop.f32.mrf.mxu1 }
 0x17e   :  { %v431_v21 = vmax.f32 %v384_v54, %v425_v45  ;;  %1069 = vmatpush1.bf16.msra.mxu1 %v3680_v2 }
 0x17f   :  { %v2931_v13 = vpop.f32.mrf.mxu1  ;;  %1070 = vmatprep.subr.bf16.mxu1 %v3687_v3  ;;  %1173 = vmatpush2.bf16.msra.mxu0 %v3786_v25 }
 0x180   :  { %v4037_v19 = vmax.f32 %v431_v21, %v3954_v22  ;;  %1174 = vmatprep.subr.bf16.mxu0 %v3793_v43  ;;  %v5389_v22 = vld [vmem:[#allocation9_spill] sm:$0xff]  ;;  %v5390_v21 = vld [vmem:[#allocation10_spill] sm:$0xff]  ;;  %v5391_v13 = vld [vmem:[#allocation3_spill] sm:$0xff] }
 0x181   :  { %v428_v54 = vpop.f32.mrf.mxu1 }
 0x182   :  { %5388 = vst [vmem:[#allocation14_spill] sm:$0xff] %v4037_v19  ;;  %1071 = vmatpush1.bf16.msra.mxu1 %v3694_v4 }
 0x183   :  { %v2932_v45 = vpop.f32.mrf.mxu1  ;;  %1072 = vmatprep.subr.bf16.mxu1 %v3701_v5  ;;  %1175 = vmatpush2.bf16.msra.mxu0 %v3800_v58 }
 0x184   :  { %1176 = vmatprep.subr.bf16.mxu0 %v3807_v24 }
 0x186   :  { %1073 = vmatpush1.bf16.msra.mxu1 %v3708_v6 }
 0x187   :  { %1074 = vmatprep.subr.bf16.mxu1 %v3715_v7  ;;  %1177 = vmatpush2.bf16.msra.mxu0 %v3814_v41 }
 0x188   :  { %1178 = vmatprep.subr.bf16.mxu0 %v3821_v53 }
 0x18a   :  { %1075 = vmatpush1.bf16.msra.mxu1 %v3722_v8 }
 0x18b   :  { %1076 = vmatprep.subr.bf16.mxu1 %v3729_v9  ;;  %1179 = vmatpush2.bf16.msra.mxu0 %v5389_v22 }
 0x18c   :  { %1180 = vmatprep.subr.bf16.mxu0 %v5390_v21 }
 0x18e   :  { %1077 = vmatpush2.bf16.msra.mxu1 %v3736_v10 }
 0x18f   :  { %1078 = vmatprep.subr.bf16.mxu1 %v5384_v16  ;;  %1181 = vmatpush2.bf16.msra.mxu0 %v3842_v12 }
 0x190   :  { %1282 = vmatprep.subr.bf16.mxu0 %v3417_v26 }
 0x192   :  { %1079 = vmatpush2.bf16.msra.mxu1 %v3750_v15  ;;  %1183 = vmatmul.mubr.bf16.vlgmr.msra.gmra.mxu0 %v5391_v13 }
 0x193   :  { %1080 = vmatprep.subr.bf16.mxu1 %v3761_v17  ;;  %1283 = vmatpush1.bf16.msra.mxu0 %v3427_v27 }
 0x194   :  { %1284 = vmatprep.subr.bf16.mxu0 %v3433_v28  ;;  %2642 = vmatprep.mubr.msk.bf16.mxu0 %vm210_vm1, %v4060_v0 }
 0x196   :  { %1081 = vmatpush2.bf16.msra.mxu1 %v3768_v18 }
 0x197   :  { %1082 = vmatprep.subr.bf16.mxu1 %v3778_v23  ;;  %1285 = vmatpush1.bf16.msra.mxu0 %v3442_v29 }
 0x198   :  { %1286 = vmatprep.subr.bf16.mxu0 %v3448_v30 }
 0x19a   :  { %1083 = vmatpush2.bf16.msra.mxu1 %v3786_v25 }
 0x19b   :  { %1084 = vmatprep.subr.bf16.mxu1 %v3793_v43  ;;  %1287 = vmatpush1.bf16.msra.mxu0 %v3458_v31 }
 0x19c   :  { %1288 = vmatprep.subr.bf16.mxu0 %v3464_v32 }
 0x19e   :  { %1085 = vmatpush2.bf16.msra.mxu1 %v3800_v58 }
 0x19f   :  { %1086 = vmatprep.subr.bf16.mxu1 %v3807_v24  ;;  %1289 = vmatpush1.bf16.msra.mxu0 %v3472_v33 }
 0x1a0   :  { %1290 = vmatprep.subr.bf16.mxu0 %v3478_v34 }
 0x1a2   :  { %1087 = vmatpush2.bf16.msra.mxu1 %v3814_v41  ;;  %v4080_v54 = vpop.f32.mrf.mxu0 }
 0x1a3   :  { %1088 = vmatprep.subr.bf16.mxu1 %v3821_v53  ;;  %1291 = vmatpush1.bf16.msra.mxu0 %v3486_v35 }
 0x1a4   :  { %1292 = vmatprep.subr.bf16.mxu0 %v3492_v36  ;;  %v4085_v45 = vpop.f32.mrf.mxu0 }
 0x1a6   :  { %1089 = vmatpush2.bf16.msra.mxu1 %v5389_v22  ;;  %v957_v13 = vpop.f32.mrf.mxu0 }
 0x1a7   :  { %1090 = vmatprep.subr.bf16.mxu1 %v5390_v21  ;;  %1293 = vmatpush1.bf16.msra.mxu0 %v3500_v37  ;;  %v5393_v13 = vld [vmem:[#allocation5_spill] sm:$0xff] }
 0x1a8   :  { %1294 = vmatprep.subr.bf16.mxu0 %v3506_v38  ;;  %v958_v19 = vpop.f32.mrf.mxu0 }
 0x1a9   :  { %v5406_v19 = vld [vmem:[#allocation13_spill] sm:$0xff] }
 0x1aa   :  { %1091 = vmatpush2.bf16.msra.mxu1 %v3842_v12 }
 0x1ab   :  { %1191 = vmatprep.subr.bf16.mxu1 %v3417_v26  ;;  %1295 = vmatpush1.bf16.msra.mxu0 %v3514_v39 }
 0x1ac   :  { %1296 = vmatprep.subr.bf16.mxu0 %v3520_v40 }
 0x1ad   :  { %1093 = vmatmul.mubr.bf16.vlgmr.msra.gmra.mxu1 %v5392_v20  ;;  %v4337_v20 = vld [vmem:[%s5287_s4 + $0x104] ss:$8 sps:$4 sm:$0xff]  }
 0x1ae   :  { %1192 = vmatpush1.bf16.msra.mxu1 %v3427_v27  ;;  %2641 = vmatprep.mubr.msk.bf16.mxu1 %vm210_vm1, %v5393_v13 }
 0x1af   :  { %1193 = vmatprep.subr.bf16.mxu1 %v3433_v28  ;;  %1297 = vmatpush1.bf16.msra.mxu0 %v3528_v42 }
 0x1b0   :  { %1306 = vmatprep.subr.bf16.mxu0 %v3535_v44 }
 0x1b2   :  { %1194 = vmatpush1.bf16.msra.mxu1 %v3442_v29  ;;  %v4125_v29 = vsel %vm210_vm1, %v3912_v14, %v4060_v0  ;;  %v4331_v14 = vld [vmem:[%s5287_s4 + $0x110] ss:$8 sps:$4 sm:$0xff]  }
 0x1b3   :  { %1195 = vmatprep.subr.bf16.mxu1 %v3448_v30  ;;  %1307 = vmatpush2.bf16.msra.mxu0 %v3549_v46  ;;  %5394 = vst [vmem:[#allocation9_spill] sm:$0xff] %v4125_v29 }
 0x1b4   :  { %1308 = vmatprep.subr.bf16.mxu0 %v3555_v47 }
 0x1b6   :  { %1196 = vmatpush1.bf16.msra.mxu1 %v3458_v31  ;;  %v5395_v31 = vld [vmem:[#allocation4_spill] sm:$0xff] }
 0x1b7   :  { %1197 = vmatprep.subr.bf16.mxu1 %v3464_v32  ;;  %1309 = vmatpush2.bf16.msra.mxu0 %v3565_v48  ;;  %v5396_v32 = vld [vmem:[#allocation6_spill] sm:$0xff] }
 0x1b8   :  { %1310 = vmatprep.subr.bf16.mxu0 %v3571_v49 }
 0x1ba   :  { %1198 = vmatpush1.bf16.msra.mxu1 %v3472_v33 }
 0x1bb   :  { %1199 = vmatprep.subr.bf16.mxu1 %v3478_v34  ;;  %1311 = vmatpush2.bf16.msra.mxu0 %v3579_v50 }
 0x1bc   :  { %1312 = vmatprep.subr.bf16.mxu0 %v3585_v51 }
 0x1bd   :  { %v4114_v26 = vpop.f32.mrf.mxu1 }
 0x1be   :  { %1200 = vmatpush1.bf16.msra.mxu1 %v3486_v35 }
 0x1bf   :  { %v4117_v27 = vpop.f32.mrf.mxu1  ;;  %1201 = vmatprep.subr.bf16.mxu1 %v3492_v36  ;;  %1313 = vmatpush2.bf16.msra.mxu0 %v3593_v52 }
 0x1c0   :  { %1332 = vmatprep.subr.bf16.mxu0 %v3615_v55 }
 0x1c1   :  { %v817_v28 = vpop.f32.mrf.mxu1 }
 0x1c2   :  { %1202 = vmatpush1.bf16.msra.mxu1 %v3500_v37  ;;  %1315 = vmatmul.mubr.bf16.vlgmr.msra.gmra.mxu0 %v4125_v29  ;;  %v4182_v37 = vld [vmem:[%s5286_s1 + $0x20] sm:$0xff] }
 0x1c3   :  { %v818_v30 = vpop.f32.mrf.mxu1  ;;  %1203 = vmatprep.subr.bf16.mxu1 %v3506_v38  ;;  %1333 = vmatpush1.bf16.msra.mxu0 %v3622_v56  ;;  %v4187_v38 = vcombine.low %v4182_v37, %v4182_v37  ;;  %v4376_v28 = vld [vmem:[%s5287_s4 + $0x1a0] ss:$8 sps:$4 sm:$0xff]  }
 0x1c4   :  { %1334 = vmatprep.subr.bf16.mxu0 %v3629_v57  ;;  %1364 = vmatprep.mubr.bf16.mxu0 %v5395_v31  ;;  %v4382_v30 = vld [vmem:[%s5287_s4 + $0x194] ss:$8 sps:$4 sm:$0xff]  }
 0x1c5   :  { %5397 = vst [vmem:[#allocation10_spill] sm:$0xff] %v4187_v38  ;;  %1779 = vrot.lane.b32.xlu0 %v4187_v38, %s3180_s13  ;;  %v4527_v38 = vld [vmem:[%s5287_s4 + $0x4] ss:$8 sps:$4 sm:$0xff]  }
 0x1c6   :  { %1204 = vmatpush1.bf16.msra.mxu1 %v3514_v39 }
 0x1c7   :  { %1205 = vmatprep.subr.bf16.mxu1 %v3520_v40  ;;  %1335 = vmatpush1.bf16.msra.mxu0 %v3637_v59  ;;  %v4208_v40 = vadd.f32 %v4014_v11, %v4114_v26  ;;  %v5405_v11 = vld [vmem:[#allocation8_spill] sm:$0xff] }
 0x1c8   :  { %1336 = vmatprep.subr.bf16.mxu0 %v3645_v60  ;;  %v4362_v26 = vld [vmem:[%s5287_s4 + $0x1b0] ss:$8 sps:$4 sm:$0xff]  }
 0x1ca   :  { %1206 = vmatpush1.bf16.msra.mxu1 %v3528_v42 }
 0x1cb   :  { %1215 = vmatprep.subr.bf16.mxu1 %v3535_v44  ;;  %1337 = vmatpush1.bf16.msra.mxu0 %v3652_v61 }
 0x1cc   :  { %1338 = vmatprep.subr.bf16.mxu0 %v3659_v62 }
 0x1ce   :  { %1216 = vmatpush2.bf16.msra.mxu1 %v3549_v46  ;;  %v5398_v46 = vld [vmem:[#allocation7_spill] sm:$0xff] }
 0x1cf   :  { %1217 = vmatprep.subr.bf16.mxu1 %v3555_v47  ;;  %1339 = vmatpush1.bf16.msra.mxu0 %v3666_v63  ;;  %v4218_v47 = vadd.f32 %v5398_v46, %v4117_v27  ;;  %v4368_v27 = vld [vmem:[%s5287_s4 + $0x1a4] ss:$8 sps:$4 sm:$0xff]  }
 0x1d0   :  { %1340 = vmatprep.subr.bf16.mxu0 %v3673_v1 }
 0x1d2   :  { %1218 = vmatpush2.bf16.msra.mxu1 %v3565_v48 }
 0x1d3   :  { %1219 = vmatprep.subr.bf16.mxu1 %v3571_v49  ;;  %1341 = vmatpush1.bf16.msra.mxu0 %v3680_v2 }
 0x1d4   :  { %1342 = vmatprep.subr.bf16.mxu0 %v3687_v3 }
 0x1d6   :  { %1220 = vmatpush2.bf16.msra.mxu1 %v3579_v50  ;;  %v4228_v50 = vld [vmem:[%s5287_s4 + $0x174] ss:$8 sps:$4 sm:$0xff]  }
 0x1d7   :  { %1221 = vmatprep.subr.bf16.mxu1 %v3585_v51  ;;  %1343 = vmatpush1.bf16.msra.mxu0 %v3694_v4 }
 0x1d8   :  { %1344 = vmatprep.subr.bf16.mxu0 %v3701_v5 }
 0x1da   :  { %1222 = vmatpush2.bf16.msra.mxu1 %v3593_v52 }
 0x1db   :  { %1241 = vmatprep.subr.bf16.mxu1 %v3615_v55  ;;  %1345 = vmatpush1.bf16.msra.mxu0 %v3708_v6  ;;  %v5399_v55 = vld [vmem:[#allocation2_spill] sm:$0xff] }
 0x1dc   :  { %1346 = vmatprep.subr.bf16.mxu0 %v3715_v7 }
 0x1dd   :  { %1224 = vmatmul.mubr.bf16.vlgmr.msra.gmra.mxu1 %v5395_v31 }
 0x1de   :  { %1242 = vmatpush1.bf16.msra.mxu1 %v3622_v56  ;;  %1273 = vmatprep.mubr.bf16.mxu1 %v5396_v32  ;;  %v4235_v56 = vpop.permute.xlu0 %1416 }
 0x1df   :  { %1243 = vmatprep.subr.bf16.mxu1 %v3629_v57  ;;  %1347 = vmatpush1.bf16.msra.mxu0 %v3722_v8 }
 0x1e0   :  { %1348 = vmatprep.subr.bf16.mxu0 %v3729_v9 }
 0x1e2   :  { %1244 = vmatpush1.bf16.msra.mxu1 %v3637_v59  ;;  %v4164_v33 = vpop.f32.mrf.mxu0  ;;  %v4241_v59 = vld [vmem:[%s5287_s4 + $0x170] ss:$8 sps:$4 sm:$0xff]  }
 0x1e3   :  { %1245 = vmatprep.subr.bf16.mxu1 %v3645_v60  ;;  %1349 = vmatpush2.bf16.msra.mxu0 %v3736_v10  ;;  %v4247_v60 = vld [vmem:[%s5287_s4 + $0x164] ss:$8 sps:$4 sm:$0xff]  }
 0x1e4   :  { %1350 = vmatprep.subr.bf16.mxu0 %v5384_v16  ;;  %v4169_v34 = vpop.f32.mrf.mxu0 }
 0x1e6   :  { %1246 = vmatpush1.bf16.msra.mxu1 %v3652_v61  ;;  %v1007_v35 = vpop.f32.mrf.mxu0  ;;  %v4257_v61 = vld [vmem:[%s5287_s4 + $0x160] ss:$8 sps:$4 sm:$0xff]  }
 0x1e7   :  { %1247 = vmatprep.subr.bf16.mxu1 %v3659_v62  ;;  %1351 = vmatpush2.bf16.msra.mxu0 %v3750_v15  ;;  %v4263_v62 = vld [vmem:[%s5287_s4 + $0x154] ss:$8 sps:$4 sm:$0xff]   ;;  %v4390_v35 = vld [vmem:[%s5287_s4 + $0x190] ss:$8 sps:$4 sm:$0xff]  }
 0x1e8   :  { %1352 = vmatprep.subr.bf16.mxu0 %v3761_v17  ;;  %v1008_v36 = vpop.f32.mrf.mxu0 }
 0x1e9   :  { %v4396_v36 = vld [vmem:[%s5287_s4 + $0x184] ss:$8 sps:$4 sm:$0xff]  }
 0x1ea   :  { %1248 = vmatpush1.bf16.msra.mxu1 %v3666_v63  ;;  %v4271_v63 = vld [vmem:[%s5287_s4 + $0x150] ss:$8 sps:$4 sm:$0xff]  }
 0x1eb   :  { %1249 = vmatprep.subr.bf16.mxu1 %v3673_v1  ;;  %1353 = vmatpush2.bf16.msra.mxu0 %v3768_v18  ;;  %5400 = vst [vmem:[#allocation3_spill] sm:$0xff] %v4271_v63  ;;  %v4277_v1 = vld [vmem:[%s5287_s4 + $0x144] ss:$8 sps:$4 sm:$0xff]  }
 0x1ec   :  { %1354 = vmatprep.subr.bf16.mxu0 %v3778_v23  ;;  %5401 = vst [vmem:[#allocation11_spill] sm:$0xff] %v4277_v1 }
 0x1ee   :  { %1250 = vmatpush1.bf16.msra.mxu1 %v3680_v2  ;;  %v4285_v2 = vld [vmem:[%s5287_s4 + $0x140] ss:$8 sps:$4 sm:$0xff]  }
 0x1ef   :  { %1251 = vmatprep.subr.bf16.mxu1 %v3687_v3  ;;  %1355 = vmatpush2.bf16.msra.mxu0 %v3786_v25  ;;  %5402 = vst [vmem:[#allocation4_spill] sm:$0xff] %v4285_v2  ;;  %v4291_v3 = vld [vmem:[%s5287_s4 + $0x134] ss:$8 sps:$4 sm:$0xff]  }
 0x1f0   :  { %1356 = vmatprep.subr.bf16.mxu0 %v3793_v43  ;;  %5403 = vst [vmem:[#allocation6_spill] sm:$0xff] %v4291_v3 }
 0x1f2   :  { %1252 = vmatpush1.bf16.msra.mxu1 %v3694_v4 }
 0x1f3   :  { %1253 = vmatprep.subr.bf16.mxu1 %v3701_v5  ;;  %1357 = vmatpush2.bf16.msra.mxu0 %v3800_v58  ;;  %v4301_v5 = vld [vmem:[%s5287_s4 + $0x130] ss:$8 sps:$4 sm:$0xff]  }
 0x1f4   :  { %1358 = vmatprep.subr.bf16.mxu0 %v3807_v24 }
 0x1f6   :  { %1254 = vmatpush1.bf16.msra.mxu1 %v3708_v6 }
 0x1f7   :  { %1255 = vmatprep.subr.bf16.mxu1 %v3715_v7  ;;  %1359 = vmatpush2.bf16.msra.mxu0 %v3814_v41  ;;  %v4309_v7 = vld [vmem:[%s5287_s4 + $0x124] ss:$8 sps:$4 sm:$0xff]  }
 0x1f8   :  { %1360 = vmatprep.subr.bf16.mxu0 %v3821_v53  ;;  %5404 = vst [vmem:[#allocation7_spill] sm:$0xff] %v4309_v7 }
 0x1fa   :  { %1256 = vmatpush1.bf16.msra.mxu1 %v3722_v8 }
 0x1fb   :  { %1257 = vmatprep.subr.bf16.mxu1 %v3729_v9  ;;  %1361 = vmatpush2.bf16.msra.mxu0 %v5389_v22  ;;  %v4317_v9 = vld [vmem:[%s5287_s4 + $0x120] ss:$8 sps:$4 sm:$0xff]  }
 0x1fc   :  { %1362 = vmatprep.subr.bf16.mxu0 %v5390_v21 }
 0x1fd   :  { %v912_v39 = vpop.f32.mrf.mxu1 }
 0x1fe   :  { %v4211_v42 = vadd.f32 %v4080_v54, %v912_v39  ;;  %1258 = vmatpush2.bf16.msra.mxu1 %v3736_v10  ;;  %v4348_v54 = vld [vmem:[%s5287_s4 + $0x100] ss:$8 sps:$4 sm:$0xff]  }
 0x1ff   :  { %v914_v44 = vpop.f32.mrf.mxu1  ;;  %1259 = vmatprep.subr.bf16.mxu1 %v5384_v16  ;;  %1363 = vmatpush2.bf16.msra.mxu0 %v3842_v12 }
 0x200   :  { %v960_v48 = vmax.f32 %v4208_v40, %v4211_v42  ;;  %v4223_v49 = vadd.f32 %v4085_v45, %v914_v44  ;;  %1464 = vmatprep.subr.bf16.mxu0 %v4228_v50  ;;  %v4354_v45 = vld [vmem:[%s5287_s4 + $0x1b4] ss:$8 sps:$4 sm:$0xff]   ;;  %v4436_v42 = vld [vmem:[%s5287_s4 + $0x70] ss:$8 sps:$4 sm:$0xff]  }
 0x201   :  { %v916_v51 = vpop.f32.mrf.mxu1  ;;  %5408 = vst [vmem:[#allocation8_spill] sm:$0xff] %v4436_v42 }
 0x202   :  { %v961_v52 = vmax.f32 %v4218_v47, %v4223_v49  ;;  %1260 = vmatpush2.bf16.msra.mxu1 %v3750_v15  ;;  %1365 = vmatmul.mubr.bf16.vlgmr.msra.gmra.mxu0 %v5399_v55  ;;  %v4323_v15 = vld [vmem:[%s5287_s4 + $0x114] ss:$8 sps:$4 sm:$0xff]   ;;  %v4405_v51 = vld [vmem:[%s5287_s4 + $0x180] ss:$8 sps:$4 sm:$0xff]   ;;  %v4465_v49 = vld [vmem:[%s5287_s4 + $0x50] ss:$8 sps:$4 sm:$0xff]  }
 0x203   :  { %v917_v57 = vpop.f32.mrf.mxu1  ;;  %1261 = vmatprep.subr.bf16.mxu1 %v3761_v17  ;;  %1465 = vmatpush1.bf16.msra.mxu0 %v4241_v59  ;;  %v4451_v47 = vld [vmem:[%s5287_s4 + $0x60] ss:$8 sps:$4 sm:$0xff]  }
 0x204   :  { %1466 = vmatprep.subr.bf16.mxu0 %v4247_v60  ;;  %2645 = vmatprep.mubr.msk.bf16.mxu0 %vm210_vm1, %v4235_v56  ;;  %5410 = vst [vmem:[#allocation16_spill] sm:$0xff] %v4451_v47 }
 0x206   :  { %1262 = vmatpush2.bf16.msra.mxu1 %v3768_v18 }
 0x207   :  { %1263 = vmatprep.subr.bf16.mxu1 %v3778_v23  ;;  %1467 = vmatpush1.bf16.msra.mxu0 %v4257_v61 }
 0x208   :  { %1468 = vmatprep.subr.bf16.mxu0 %v4263_v62 }
 0x20a   :  { %1264 = vmatpush2.bf16.msra.mxu1 %v3786_v25 }
 0x20b   :  { %1265 = vmatprep.subr.bf16.mxu1 %v3793_v43  ;;  %1469 = vmatpush1.bf16.msra.mxu0 %v4271_v63 }
 0x20c   :  { %1470 = vmatprep.subr.bf16.mxu0 %v4277_v1 }
 0x20e   :  { %1266 = vmatpush2.bf16.msra.mxu1 %v3800_v58 }
 0x20f   :  { %1267 = vmatprep.subr.bf16.mxu1 %v3807_v24  ;;  %1471 = vmatpush1.bf16.msra.mxu0 %v4285_v2 }
 0x210   :  { %1472 = vmatprep.subr.bf16.mxu0 %v4291_v3 }
 0x212   :  { %1268 = vmatpush2.bf16.msra.mxu1 %v3814_v41  ;;  %v4295_v4 = vpop.f32.mrf.mxu0 }
 0x213   :  { %1269 = vmatprep.subr.bf16.mxu1 %v3821_v53  ;;  %1473 = vmatpush1.bf16.msra.mxu0 %v4301_v5 }
 0x214   :  { %v4304_v6 = vpop.f32.mrf.mxu0  ;;  %1474 = vmatprep.subr.bf16.mxu0 %v4309_v7 }
 0x216   :  { %1270 = vmatpush2.bf16.msra.mxu1 %v5389_v22  ;;  %v1139_v8 = vpop.f32.mrf.mxu0 }
 0x217   :  { %1271 = vmatprep.subr.bf16.mxu1 %v5390_v21  ;;  %1475 = vmatpush1.bf16.msra.mxu0 %v4317_v9 }
 0x218   :  { %v1140_v10 = vpop.f32.mrf.mxu0  ;;  %1476 = vmatprep.subr.bf16.mxu0 %v4323_v15 }
 0x219   :  { %v4423_v10 = vsel %vm210_vm1, %v4060_v0, %v4235_v56  ;;  %v4442_v0 = vld [vmem:[%s5287_s4 + $0x64] ss:$8 sps:$4 sm:$0xff]  }
 0x21a   :  { %1272 = vmatpush2.bf16.msra.mxu1 %v3842_v12  ;;  %5407 = vst [vmem:[#allocation2_spill] sm:$0xff] %v4423_v10  ;;  %5409 = vst [vmem:[#allocation15_spill] sm:$0xff] %v4442_v0 }
 0x21b   :  { %1373 = vmatprep.subr.bf16.mxu1 %v4228_v50  ;;  %1477 = vmatpush1.bf16.msra.mxu0 %v4331_v14 }
 0x21c   :  { %1478 = vmatprep.subr.bf16.mxu0 %v4337_v20 }
 0x21d   :  { %1274 = vmatmul.mubr.bf16.vlgmr.msra.gmra.mxu1 %v5405_v11  ;;  %v4479_v11 = vld [vmem:[%s5287_s4 + $0x40] ss:$8 sps:$4 sm:$0xff]  }
 0x21e   :  { %1374 = vmatpush1.bf16.msra.mxu1 %v4241_v59  ;;  %2644 = vmatprep.mubr.msk.bf16.mxu1 %vm210_vm1, %v5406_v19  ;;  %v4543_v19 = vld [vmem:[%s5287_s4 + $0xf4] ss:$8 sps:$4 sm:$0xff]  }
 0x21f   :  { %1375 = vmatprep.subr.bf16.mxu1 %v4247_v60  ;;  %1479 = vmatpush1.bf16.msra.mxu0 %v4348_v54  ;;  %5412 = vst [vmem:[#allocation18_spill] sm:$0xff] %v4543_v19 }
 0x220   :  { %1488 = vmatprep.subr.bf16.mxu0 %v4354_v45 }
 0x222   :  { %1376 = vmatpush1.bf16.msra.mxu1 %v4257_v61 }
 0x223   :  { %1377 = vmatprep.subr.bf16.mxu1 %v4263_v62  ;;  %1489 = vmatpush2.bf16.msra.mxu0 %v4362_v26 }
 0x224   :  { %1490 = vmatprep.subr.bf16.mxu0 %v4368_v27 }
 0x226   :  { %1378 = vmatpush1.bf16.msra.mxu1 %v4271_v63 }
 0x227   :  { %1379 = vmatprep.subr.bf16.mxu1 %v4277_v1  ;;  %1491 = vmatpush2.bf16.msra.mxu0 %v4376_v28 }
 0x228   :  { %1492 = vmatprep.subr.bf16.mxu0 %v4382_v30 }
 0x22a   :  { %1380 = vmatpush1.bf16.msra.mxu1 %v4285_v2 }
 0x22b   :  { %1381 = vmatprep.subr.bf16.mxu1 %v4291_v3  ;;  %1493 = vmatpush2.bf16.msra.mxu0 %v4390_v35 }
 0x22c   :  { %1494 = vmatprep.subr.bf16.mxu0 %v4396_v36 }
 0x22d   :  { %v1044_v39 = vpop.f32.mrf.mxu1 }
 0x22e   :  { %v1045_v44 = vadd.f32 %v1044_v39, %v4164_v33  ;;  %1382 = vmatpush1.bf16.msra.mxu1 %v4301_v5  ;;  %v4417_v33 = vld [vmem:[%s5287_s4 + $0x74] ss:$8 sps:$4 sm:$0xff]  }
 0x22f   :  { %v1046_v46 = vpop.f32.mrf.mxu1  ;;  %1383 = vmatprep.subr.bf16.mxu1 %v4309_v7  ;;  %1495 = vmatpush2.bf16.msra.mxu0 %v4405_v51  ;;  %v4485_v39 = vld [vmem:[%s5287_s4 + $0x34] ss:$8 sps:$4 sm:$0xff]  }
 0x230   :  { %v4411_v55 = vmax.f32 %v960_v48, %v1045_v44  ;;  %v1047_v57 = vadd.f32 %v1046_v46, %v4169_v34  ;;  %1513 = vmatprep.subr.bf16.mxu0 %v4417_v33  ;;  %v4457_v48 = vld [vmem:[%s5287_s4 + $0x54] ss:$8 sps:$4 sm:$0xff]   ;;  %v4493_v44 = vld [vmem:[%s5287_s4 + $0x30] ss:$8 sps:$4 sm:$0xff]   ;;  %v4499_v46 = vld [vmem:[%s5287_s4 + $0x24] ss:$8 sps:$4 sm:$0xff]  }
 0x231   :  { %v1048_v8 = vpop.f32.mrf.mxu1  ;;  %5411 = vst [vmem:[#allocation17_spill] sm:$0xff] %v4457_v48 }
 0x232   :  { %v4428_v40 = vmax.f32 %v961_v52, %v1047_v57  ;;  %1384 = vmatpush1.bf16.msra.mxu1 %v4317_v9  ;;  %1497 = vmatmul.mubr.bf16.vlgmr.msra.gmra.mxu0 %v4423_v10  ;;  %v4471_v52 = vld [vmem:[%s5287_s4 + $0x44] ss:$8 sps:$4 sm:$0xff]   ;;  %v4507_v57 = vld [vmem:[%s5287_s4 + $0x20] ss:$8 sps:$4 sm:$0xff]   ;;  %v4513_v8 = vld [vmem:[%s5287_s4 + $0x14] ss:$8 sps:$4 sm:$0xff]  }
 0x233   :  { %v1049_v34 = vpop.f32.mrf.mxu1  ;;  %1385 = vmatprep.subr.bf16.mxu1 %v4323_v15  ;;  %1514 = vmatpush1.bf16.msra.mxu0 %v4436_v42  ;;  %v4537_v10 = vld [vmem:[%s5287_s4] ss:$8 sps:$4 sm:$0xff]  }
 0x234   :  { %1515 = vmatprep.subr.bf16.mxu0 %v4442_v0  ;;  %1545 = vmatprep.mubr.bf16.mxu0 %v5393_v13  ;;  %v4521_v34 = vld [vmem:[%s5287_s4 + $0x10] ss:$8 sps:$4 sm:$0xff]  }
 0x236   :  { %1386 = vmatpush1.bf16.msra.mxu1 %v4331_v14 }
 0x237   :  { %1387 = vmatprep.subr.bf16.mxu1 %v4337_v20  ;;  %1516 = vmatpush1.bf16.msra.mxu0 %v4451_v47 }
 0x238   :  { %1517 = vmatprep.subr.bf16.mxu0 %v4457_v48 }
 0x23a   :  { %1388 = vmatpush1.bf16.msra.mxu1 %v4348_v54 }
 0x23b   :  { %1397 = vmatprep.subr.bf16.mxu1 %v4354_v45  ;;  %1518 = vmatpush1.bf16.msra.mxu0 %v4465_v49 }
 0x23c   :  { %1519 = vmatprep.subr.bf16.mxu0 %v4471_v52 }
 0x23e   :  { %1398 = vmatpush2.bf16.msra.mxu1 %v4362_v26 }
 0x23f   :  { %1399 = vmatprep.subr.bf16.mxu1 %v4368_v27  ;;  %1520 = vmatpush1.bf16.msra.mxu0 %v4479_v11 }
 0x240   :  { %1521 = vmatprep.subr.bf16.mxu0 %v4485_v39 }
 0x242   :  { %1400 = vmatpush2.bf16.msra.mxu1 %v4376_v28 }
 0x243   :  { %1401 = vmatprep.subr.bf16.mxu1 %v4382_v30  ;;  %1522 = vmatpush1.bf16.msra.mxu0 %v4493_v44 }
 0x244   :  { %1523 = vmatprep.subr.bf16.mxu0 %v4499_v46 }
 0x246   :  { %1402 = vmatpush2.bf16.msra.mxu1 %v4390_v35 }
 0x247   :  { %1403 = vmatprep.subr.bf16.mxu1 %v4396_v36  ;;  %1524 = vmatpush1.bf16.msra.mxu0 %v4507_v57 }
 0x248   :  { %1525 = vmatprep.subr.bf16.mxu0 %v4513_v8 }
 0x24a   :  { %1404 = vmatpush2.bf16.msra.mxu1 %v4405_v51 }
 0x24b   :  { %1423 = vmatprep.subr.bf16.mxu1 %v4417_v33  ;;  %1526 = vmatpush1.bf16.msra.mxu0 %v4521_v34 }
 0x24c   :  { %1527 = vmatprep.subr.bf16.mxu0 %v4527_v38 }
 0x24d   :  { %1406 = vmatmul.mubr.bf16.vlgmr.msra.gmra.mxu1 %v5393_v13 }
 0x24e   :  { %1424 = vmatpush1.bf16.msra.mxu1 %v4436_v42  ;;  %1455 = vmatprep.mubr.bf16.mxu1 %v4125_v29  ;;  %v4553_v29 = vld [vmem:[%s5287_s4 + $0xf0] ss:$8 sps:$4 sm:$0xff]  }
 0x24f   :  { %1425 = vmatprep.subr.bf16.mxu1 %v4442_v0  ;;  %1528 = vmatpush1.bf16.msra.mxu0 %v4537_v10  ;;  %5413 = vst [vmem:[#allocation19_spill] sm:$0xff] %v4553_v29 }
 0x250   :  { %1529 = vmatprep.subr.bf16.mxu0 %v4543_v19 }
 0x252   :  { %1426 = vmatpush1.bf16.msra.mxu1 %v4451_v47  ;;  %v4547_v13 = vpop.f32.mrf.mxu0 }
 0x253   :  { %1427 = vmatprep.subr.bf16.mxu1 %v4457_v48  ;;  %1530 = vmatpush2.bf16.msra.mxu0 %v4553_v29  ;;  %v4564_v48 = vld [vmem:[%s5287_s4 + $0xe0] ss:$8 sps:$4 sm:$0xff]  }
 0x254   :  { %1531 = vmatprep.subr.bf16.mxu0 %v5384_v16  ;;  %v4557_v0 = vpop.f32.mrf.mxu0  ;;  %v4575_v16 = vcombine.high %v4182_v37, %v4182_v37  ;;  %v4644_v37 = vld [vmem:[%s5287_s4 + $0xc0] ss:$8 sps:$4 sm:$0xff]  }
 0x256   :  { %1428 = vmatpush1.bf16.msra.mxu1 %v4465_v49  ;;  %v1188_v42 = vpop.f32.mrf.mxu0  ;;  %5414 = vst [vmem:[#allocation20_spill] sm:$0xff] %v4575_v16  ;;  %1960 = vrot.lane.b32.xlu1 %v4575_v16, %s3180_s13 }
 0x257   :  { %1429 = vmatprep.subr.bf16.mxu1 %v4471_v52  ;;  %1532 = vmatpush2.bf16.msra.mxu0 %v4564_v48  ;;  %v4664_v42 = vld [vmem:[%s5287_s4 + $0xa4] ss:$8 sps:$4 sm:$0xff]  }
 0x258   :  { %1533 = vmatprep.subr.bf16.mxu0 %v3761_v17  ;;  %v1189_v47 = vpop.f32.mrf.mxu0  ;;  %5417 = vst [vmem:[#allocation23_spill] sm:$0xff] %v4664_v42 }
 0x259   :  { %v4672_v47 = vld [vmem:[%s5287_s4 + $0xa0] ss:$8 sps:$4 sm:$0xff]  }
 0x25a   :  { %1430 = vmatpush1.bf16.msra.mxu1 %v4479_v11 }
 0x25b   :  { %1431 = vmatprep.subr.bf16.mxu1 %v4485_v39  ;;  %1534 = vmatpush2.bf16.msra.mxu0 %v3768_v18 }
 0x25c   :  { %1535 = vmatprep.subr.bf16.mxu0 %v3778_v23 }
 0x25e   :  { %1432 = vmatpush1.bf16.msra.mxu1 %v4493_v44 }
 0x25f   :  { %1433 = vmatprep.subr.bf16.mxu1 %v4499_v46  ;;  %1536 = vmatpush2.bf16.msra.mxu0 %v3786_v25  ;;  %v4601_v25 = vld [vmem:[%s5287_s4 + $0xe4] ss:$8 sps:$4 sm:$0xff]  }
 0x260   :  { %1537 = vmatprep.subr.bf16.mxu0 %v3793_v43  ;;  %5415 = vst [vmem:[#allocation21_spill] sm:$0xff] %v4601_v25  ;;  %v4696_v43 = vld [vmem:[%s5287_s4 + $0x84] ss:$8 sps:$4 sm:$0xff]  }
 0x262   :  { %1434 = vmatpush1.bf16.msra.mxu1 %v4507_v57 }
 0x263   :  { %1435 = vmatprep.subr.bf16.mxu1 %v4513_v8  ;;  %1538 = vmatpush2.bf16.msra.mxu0 %v3800_v58 }
 0x264   :  { %1539 = vmatprep.subr.bf16.mxu0 %v3807_v24 }
 0x266   :  { %1436 = vmatpush1.bf16.msra.mxu1 %v4521_v34 }
 0x267   :  { %1437 = vmatprep.subr.bf16.mxu1 %v4527_v38  ;;  %1540 = vmatpush2.bf16.msra.mxu0 %v3814_v41 }
 0x268   :  { %1541 = vmatprep.subr.bf16.mxu0 %v3821_v53  ;;  %v4615_v53 = vpop.permute.xlu1 %1597 }
 0x26a   :  { %1438 = vmatpush1.bf16.msra.mxu1 %v4537_v10 }
 0x26b   :  { %1439 = vmatprep.subr.bf16.mxu1 %v4543_v19  ;;  %1542 = vmatpush2.bf16.msra.mxu0 %v5389_v22 }
 0x26c   :  { %1543 = vmatprep.subr.bf16.mxu0 %v5390_v21  ;;  %v4630_v21 = vld [vmem:[%s5287_s4 + $0xd0] ss:$8 sps:$4 sm:$0xff]  }
 0x26d   :  { %v1094_v17 = vpop.f32.mrf.mxu1 }
 0x26e   :  { %v4595_v18 = vadd.f32 %v4295_v4, %v1094_v17  ;;  %1440 = vmatpush2.bf16.msra.mxu1 %v4553_v29  ;;  %v4650_v4 = vld [vmem:[%s5287_s4 + $0xb4] ss:$8 sps:$4 sm:$0xff]  }
 0x26f   :  { %v1096_v23 = vpop.f32.mrf.mxu1  ;;  %1441 = vmatprep.subr.bf16.mxu1 %v4601_v25  ;;  %1544 = vmatpush2.bf16.msra.mxu0 %v3842_v12  ;;  %v4620_v12 = vld [vmem:[%s5287_s4 + $0xd4] ss:$8 sps:$4 sm:$0xff]  }
 0x270   :  { %v4608_v58 = vadd.f32 %v4304_v6, %v1096_v23  ;;  %1645 = vmatprep.subr.bf16.mxu0 %v4228_v50  ;;  %v4658_v6 = vld [vmem:[%s5287_s4 + $0xb0] ss:$8 sps:$4 sm:$0xff]   ;;  %v4680_v23 = vld [vmem:[%s5287_s4 + $0x94] ss:$8 sps:$4 sm:$0xff]  }
 0x271   :  { %v1098_v24 = vpop.f32.mrf.mxu1  ;;  %5416 = vst [vmem:[#allocation22_spill] sm:$0xff] %v4658_v6  ;;  %5418 = vst [vmem:[#allocation24_spill] sm:$0xff] %v4680_v23 }
 0x272   :  { %1442 = vmatpush2.bf16.msra.mxu1 %v4564_v48  ;;  %1546 = vmatmul.mubr.bf16.vlgmr.msra.gmra.mxu0 %v5395_v31  ;;  %v4636_v31 = vld [vmem:[%s5287_s4 + $0xc4] ss:$8 sps:$4 sm:$0xff]  }
 0x273   :  { %v1099_v22 = vpop.f32.mrf.mxu1  ;;  %1443 = vmatprep.subr.bf16.mxu1 %v4620_v12  ;;  %1646 = vmatpush1.bf16.msra.mxu0 %v4241_v59 }
 0x274   :  { %1647 = vmatprep.subr.bf16.mxu0 %v4247_v60  ;;  %2648 = vmatprep.mubr.msk.bf16.mxu0 %vm210_vm1, %v4615_v53  ;;  %v4690_v22 = vld [vmem:[%s5287_s4 + $0x90] ss:$8 sps:$4 sm:$0xff]  }
 0x276   :  { %1444 = vmatpush2.bf16.msra.mxu1 %v4630_v21 }
 0x277   :  { %1445 = vmatprep.subr.bf16.mxu1 %v4636_v31  ;;  %1648 = vmatpush1.bf16.msra.mxu0 %v4257_v61 }
 0x278   :  { %1649 = vmatprep.subr.bf16.mxu0 %v4263_v62 }
 0x27a   :  { %1446 = vmatpush2.bf16.msra.mxu1 %v4644_v37 }
 0x27b   :  { %1447 = vmatprep.subr.bf16.mxu1 %v4650_v4  ;;  %1650 = vmatpush1.bf16.msra.mxu0 %v4271_v63 }
 0x27c   :  { %1651 = vmatprep.subr.bf16.mxu0 %v4277_v1 }
 0x27e   :  { %1448 = vmatpush2.bf16.msra.mxu1 %v4658_v6 }
 0x27f   :  { %1449 = vmatprep.subr.bf16.mxu1 %v4664_v42  ;;  %1652 = vmatpush1.bf16.msra.mxu0 %v4285_v2 }
 0x280   :  { %1653 = vmatprep.subr.bf16.mxu0 %v4291_v3 }
 0x282   :  { %1450 = vmatpush2.bf16.msra.mxu1 %v4672_v47  ;;  %v4675_v17 = vpop.f32.mrf.mxu0 }
 0x283   :  { %1451 = vmatprep.subr.bf16.mxu1 %v4680_v23  ;;  %1654 = vmatpush1.bf16.msra.mxu0 %v4301_v5 }
 0x284   :  { %v4684_v24 = vpop.f32.mrf.mxu0  ;;  %1655 = vmatprep.subr.bf16.mxu0 %v4309_v7 }
 0x285   :  { %5419 = vst [vmem:[#allocation25_spill] sm:$0xff] %v4684_v24  ;;  %v4704_v24 = vld [vmem:[%s5287_s4 + $0x80] ss:$8 sps:$4 sm:$0xff]  }
 0x286   :  { %1452 = vmatpush2.bf16.msra.mxu1 %v4690_v22  ;;  %v1320_v41 = vpop.f32.mrf.mxu0 }
 0x287   :  { %1453 = vmatprep.subr.bf16.mxu1 %v4696_v43  ;;  %1656 = vmatpush1.bf16.msra.mxu0 %v4317_v9 }
 0x288   :  { %v1321_v16 = vpop.f32.mrf.mxu0  ;;  %1657 = vmatprep.subr.bf16.mxu0 %v4323_v15 }
 0x289   :  { %v5420_v16 = vld [vmem:[#allocation12_spill] sm:$0xff] }
 0x28a   :  { %1454 = vmatpush2.bf16.msra.mxu1 %v4704_v24 }
 0x28b   :  { %1554 = vmatprep.subr.bf16.mxu1 %v4228_v50  ;;  %1658 = vmatpush1.bf16.msra.mxu0 %v4331_v14 }
 0x28c   :  { %1659 = vmatprep.subr.bf16.mxu0 %v4337_v20 }
 0x28d   :  { %1456 = vmatmul.mubr.bf16.vlgmr.msra.gmra.mxu1 %v5396_v32 }
 0x28e   :  { %1555 = vmatpush1.bf16.msra.mxu1 %v4241_v59  ;;  %2647 = vmatprep.mubr.msk.bf16.mxu1 %vm210_vm1, %v5420_v16 }
 0x28f   :  { %1556 = vmatprep.subr.bf16.mxu1 %v4247_v60  ;;  %1660 = vmatpush1.bf16.msra.mxu0 %v4348_v54 }
 0x290   :  { %1669 = vmatprep.subr.bf16.mxu0 %v4354_v45 }
 0x292   :  { %1557 = vmatpush1.bf16.msra.mxu1 %v4257_v61 }
 0x293   :  { %1558 = vmatprep.subr.bf16.mxu1 %v4263_v62  ;;  %1670 = vmatpush2.bf16.msra.mxu0 %v4362_v26 }
 0x294   :  { %1671 = vmatprep.subr.bf16.mxu0 %v4368_v27 }
 0x296   :  { %1559 = vmatpush1.bf16.msra.mxu1 %v4271_v63 }
 0x297   :  { %1560 = vmatprep.subr.bf16.mxu1 %v4277_v1  ;;  %1672 = vmatpush2.bf16.msra.mxu0 %v4376_v28  ;;  %v5421_v1 = vmax.f32 %v4411_v55, %v4595_v18  ;;  %v5424_v55 = vld [vmem:[#allocation8_spill] sm:$0xff] }
 0x298   :  { %1673 = vmatprep.subr.bf16.mxu0 %v4382_v30 }
 0x29a   :  { %1561 = vmatpush1.bf16.msra.mxu1 %v4285_v2 }
 0x29b   :  { %1562 = vmatprep.subr.bf16.mxu1 %v4291_v3  ;;  %1674 = vmatpush2.bf16.msra.mxu0 %v4390_v35 }
 0x29c   :  { %1675 = vmatprep.subr.bf16.mxu0 %v4396_v36 }
 0x29d   :  { %v1225_v32 = vpop.f32.mrf.mxu1 }
 0x29e   :  { %v1226_v41 = vadd.f32 %v1225_v32, %v4547_v13  ;;  %1563 = vmatpush1.bf16.msra.mxu1 %v4301_v5  ;;  %v4743_v13 = vsel %vm210_vm1, %v4235_v56, %v4615_v53  ;;  %v5423_v32 = vmax.f32 %v4428_v40, %v4608_v58  ;;  %v5427_v56 = vld [vmem:[#allocation16_spill] sm:$0xff]  ;;  %v5429_v40 = vld [vmem:[#allocation2_spill] sm:$0xff] }
 0x29f   :  { %v1227_v16 = vpop.f32.mrf.mxu1  ;;  %1564 = vmatprep.subr.bf16.mxu1 %v4309_v7  ;;  %1676 = vmatpush2.bf16.msra.mxu0 %v4405_v51  ;;  %5422 = vst [vmem:[#allocation26_spill] sm:$0xff] %v4743_v13 }
 0x2a0   :  { %v4736_v2 = vmax.f32 %v5421_v1, %v1226_v41  ;;  %v1228_v3 = vadd.f32 %v1227_v16, %v4557_v0  ;;  %1695 = vmatprep.subr.bf16.mxu0 %v4417_v33  ;;  %v5426_v0 = vld [vmem:[#allocation13_spill] sm:$0xff] }
 0x2a1   :  { %v1229_v63 = vpop.f32.mrf.mxu1 }
 0x2a2   :  { %v4748_v7 = vmax.f32 %v5423_v32, %v1228_v3  ;;  %1565 = vmatpush1.bf16.msra.mxu1 %v4317_v9  ;;  %1678 = vmatmul.mubr.bf16.vlgmr.msra.gmra.mxu0 %v4743_v13  ;;  %v5425_v63 = vld [vmem:[#allocation15_spill] sm:$0xff]  ;;  %v5428_v3 = vld [vmem:[#allocation17_spill] sm:$0xff] }
 0x2a3   :  { %v1230_v1 = vpop.f32.mrf.mxu1  ;;  %1566 = vmatprep.subr.bf16.mxu1 %v4323_v15  ;;  %1696 = vmatpush1.bf16.msra.mxu0 %v5424_v55 }
 0x2a4   :  { %1697 = vmatprep.subr.bf16.mxu0 %v5425_v63  ;;  %1727 = vmatprep.mubr.bf16.mxu0 %v5426_v0 }
 0x2a6   :  { %1567 = vmatpush1.bf16.msra.mxu1 %v4331_v14 }
 0x2a7   :  { %1568 = vmatprep.subr.bf16.mxu1 %v4337_v20  ;;  %1698 = vmatpush1.bf16.msra.mxu0 %v5427_v56 }
 0x2a8   :  { %1699 = vmatprep.subr.bf16.mxu0 %v5428_v3 }
 0x2aa   :  { %1569 = vmatpush1.bf16.msra.mxu1 %v4348_v54 }
 0x2ab   :  { %1578 = vmatprep.subr.bf16.mxu1 %v4354_v45  ;;  %1700 = vmatpush1.bf16.msra.mxu0 %v4465_v49 }
 0x2ac   :  { %1701 = vmatprep.subr.bf16.mxu0 %v4471_v52 }
 0x2ae   :  { %1579 = vmatpush2.bf16.msra.mxu1 %v4362_v26 }
 0x2af   :  { %1580 = vmatprep.subr.bf16.mxu1 %v4368_v27  ;;  %1702 = vmatpush1.bf16.msra.mxu0 %v4479_v11 }
 0x2b0   :  { %1703 = vmatprep.subr.bf16.mxu0 %v4485_v39 }
 0x2b2   :  { %1581 = vmatpush2.bf16.msra.mxu1 %v4376_v28 }
 0x2b3   :  { %1582 = vmatprep.subr.bf16.mxu1 %v4382_v30  ;;  %1704 = vmatpush1.bf16.msra.mxu0 %v4493_v44 }
 0x2b4   :  { %1705 = vmatprep.subr.bf16.mxu0 %v4499_v46 }
 0x2b6   :  { %1583 = vmatpush2.bf16.msra.mxu1 %v4390_v35 }
 0x2b7   :  { %1584 = vmatprep.subr.bf16.mxu1 %v4396_v36  ;;  %1706 = vmatpush1.bf16.msra.mxu0 %v4507_v57 }
 0x2b8   :  { %1707 = vmatprep.subr.bf16.mxu0 %v4513_v8 }
 0x2ba   :  { %1585 = vmatpush2.bf16.msra.mxu1 %v4405_v51 }
 0x2bb   :  { %1604 = vmatprep.subr.bf16.mxu1 %v4417_v33  ;;  %1708 = vmatpush1.bf16.msra.mxu0 %v4521_v34 }
 0x2bc   :  { %1709 = vmatprep.subr.bf16.mxu0 %v4527_v38 }
 0x2bd   :  { %1587 = vmatmul.mubr.bf16.vlgmr.msra.gmra.mxu1 %v5426_v0 }
 0x2be   :  { %1605 = vmatpush1.bf16.msra.mxu1 %v5424_v55  ;;  %1636 = vmatprep.mubr.bf16.mxu1 %v5429_v40  ;;  %v5430_v40 = vld [vmem:[#allocation25_spill] sm:$0xff] }
 0x2bf   :  { %1606 = vmatprep.subr.bf16.mxu1 %v5425_v63  ;;  %1710 = vmatpush1.bf16.msra.mxu0 %v4537_v10 }
 0x2c0   :  { %1711 = vmatprep.subr.bf16.mxu0 %v4543_v19 }
 0x2c2   :  { %1607 = vmatpush1.bf16.msra.mxu1 %v5427_v56  ;;  %v4787_v18 = vpop.f32.mrf.mxu0 }
 0x2c3   :  { %1608 = vmatprep.subr.bf16.mxu1 %v5428_v3  ;;  %1712 = vmatpush2.bf16.msra.mxu0 %v4553_v29 }
 0x2c4   :  { %1713 = vmatprep.subr.bf16.mxu0 %v4601_v25  ;;  %v4792_v58 = vpop.f32.mrf.mxu0 }
 0x2c6   :  { %1609 = vmatpush1.bf16.msra.mxu1 %v4465_v49  ;;  %v1370_v16 = vpop.f32.mrf.mxu0 }
 0x2c7   :  { %1610 = vmatprep.subr.bf16.mxu1 %v4471_v52  ;;  %1714 = vmatpush2.bf16.msra.mxu0 %v4564_v48 }
 0x2c8   :  { %1715 = vmatprep.subr.bf16.mxu0 %v4620_v12  ;;  %v1371_v41 = vpop.f32.mrf.mxu0 }
 0x2c9   :  { %v5437_v41 = vld [vmem:[#allocation7_spill] sm:$0xff] }
 0x2ca   :  { %1611 = vmatpush1.bf16.msra.mxu1 %v4479_v11 }
 0x2cb   :  { %1612 = vmatprep.subr.bf16.mxu1 %v4485_v39  ;;  %1716 = vmatpush2.bf16.msra.mxu0 %v4630_v21 }
 0x2cc   :  { %1717 = vmatprep.subr.bf16.mxu0 %v4636_v31 }
 0x2ce   :  { %1613 = vmatpush1.bf16.msra.mxu1 %v4493_v44 }
 0x2cf   :  { %1614 = vmatprep.subr.bf16.mxu1 %v4499_v46  ;;  %1718 = vmatpush2.bf16.msra.mxu0 %v4644_v37 }
 0x2d0   :  { %1719 = vmatprep.subr.bf16.mxu0 %v4650_v4 }
 0x2d2   :  { %1615 = vmatpush1.bf16.msra.mxu1 %v4507_v57 }
 0x2d3   :  { %1616 = vmatprep.subr.bf16.mxu1 %v4513_v8  ;;  %1720 = vmatpush2.bf16.msra.mxu0 %v4658_v6 }
 0x2d4   :  { %1721 = vmatprep.subr.bf16.mxu0 %v4664_v42 }
 0x2d6   :  { %1617 = vmatpush1.bf16.msra.mxu1 %v4521_v34 }
 0x2d7   :  { %1618 = vmatprep.subr.bf16.mxu1 %v4527_v38  ;;  %1722 = vmatpush2.bf16.msra.mxu0 %v4672_v47 }
 0x2d8   :  { %1723 = vmatprep.subr.bf16.mxu0 %v4680_v23 }
 0x2da   :  { %1619 = vmatpush1.bf16.msra.mxu1 %v4537_v10 }
 0x2db   :  { %1620 = vmatprep.subr.bf16.mxu1 %v4543_v19  ;;  %1724 = vmatpush2.bf16.msra.mxu0 %v4690_v22 }
 0x2dc   :  { %1725 = vmatprep.subr.bf16.mxu0 %v4696_v43 }
 0x2dd   :  { %v1275_v32 = vpop.f32.mrf.mxu1 }
 0x2de   :  { %v4819_v1 = vadd.f32 %v4675_v17, %v1275_v32  ;;  %1621 = vmatpush2.bf16.msra.mxu1 %v4553_v29  ;;  %v5431_v32 = vld [vmem:[#allocation5_spill] sm:$0xff]  ;;  %v4834_v29 = vpop.permute.xlu0 %1779 }
 0x2df   :  { %v1277_v16 = vpop.f32.mrf.mxu1  ;;  %1622 = vmatprep.subr.bf16.mxu1 %v4601_v25  ;;  %1726 = vmatpush2.bf16.msra.mxu0 %v4704_v24 }
 0x2e0   :  { %v4827_v0 = vadd.f32 %v5430_v40, %v1277_v16  ;;  %1827 = vmatprep.subr.bf16.mxu0 %v4228_v50  ;;  %v5434_v40 = vld [vmem:[#allocation4_spill] sm:$0xff]  ;;  %v5435_v16 = vld [vmem:[#allocation6_spill] sm:$0xff] }
 0x2e1   :  { %v1279_v19 = vpop.f32.mrf.mxu1 }
 0x2e2   :  { %1623 = vmatpush2.bf16.msra.mxu1 %v4564_v48  ;;  %1728 = vmatmul.mubr.bf16.vlgmr.msra.gmra.mxu0 %v5431_v32  ;;  %v5432_v19 = vld [vmem:[#allocation3_spill] sm:$0xff] }
 0x2e3   :  { %v1280_v25 = vpop.f32.mrf.mxu1  ;;  %1624 = vmatprep.subr.bf16.mxu1 %v4620_v12  ;;  %1828 = vmatpush1.bf16.msra.mxu0 %v4241_v59 }
 0x2e4   :  { %1829 = vmatprep.subr.bf16.mxu0 %v4247_v60  ;;  %2651 = vmatprep.mubr.msk.bf16.mxu0 %vm210_vm1, %v4834_v29  ;;  %v5433_v25 = vld [vmem:[#allocation11_spill] sm:$0xff] }
 0x2e6   :  { %1625 = vmatpush2.bf16.msra.mxu1 %v4630_v21 }
 0x2e7   :  { %1626 = vmatprep.subr.bf16.mxu1 %v4636_v31  ;;  %1830 = vmatpush1.bf16.msra.mxu0 %v4257_v61 }
 0x2e8   :  { %1831 = vmatprep.subr.bf16.mxu0 %v4263_v62 }
 0x2ea   :  { %1627 = vmatpush2.bf16.msra.mxu1 %v4644_v37 }
 0x2eb   :  { %1628 = vmatprep.subr.bf16.mxu1 %v4650_v4  ;;  %1832 = vmatpush1.bf16.msra.mxu0 %v5432_v19 }
 0x2ec   :  { %1833 = vmatprep.subr.bf16.mxu0 %v5433_v25 }
 0x2ee   :  { %1629 = vmatpush2.bf16.msra.mxu1 %v4658_v6 }
 0x2ef   :  { %1630 = vmatprep.subr.bf16.mxu1 %v4664_v42  ;;  %1834 = vmatpush1.bf16.msra.mxu0 %v5434_v40 }
 0x2f0   :  { %1835 = vmatprep.subr.bf16.mxu0 %v5435_v16 }
 0x2f2   :  { %1631 = vmatpush2.bf16.msra.mxu1 %v4672_v47  ;;  %v4854_v32 = vpop.f32.mrf.mxu0 }
 0x2f3   :  { %1632 = vmatprep.subr.bf16.mxu1 %v4680_v23  ;;  %1836 = vmatpush1.bf16.msra.mxu0 %v4301_v5 }
 0x2f4   :  { %v4858_v17 = vpop.f32.mrf.mxu0  ;;  %1837 = vmatprep.subr.bf16.mxu0 %v5437_v41 }
 0x2f5   :  { %5436 = vst [vmem:[#allocation8_spill] sm:$0xff] %v4858_v17  ;;  %v5438_v17 = vld [vmem:[#allocation9_spill] sm:$0xff] }
 0x2f6   :  { %1633 = vmatpush2.bf16.msra.mxu1 %v4690_v22  ;;  %v1502_v6 = vpop.f32.mrf.mxu0 }
 0x2f7   :  { %1634 = vmatprep.subr.bf16.mxu1 %v4696_v43  ;;  %1838 = vmatpush1.bf16.msra.mxu0 %v4317_v9  ;;  %v5439_v6 = vld [vmem:[#allocation10_spill] sm:$0xff] }
 0x2f8   :  { %v1503_v42 = vpop.f32.mrf.mxu0  ;;  %1839 = vmatprep.subr.bf16.mxu0 %v4323_v15 }
 0x2fa   :  { %1635 = vmatpush2.bf16.msra.mxu1 %v4704_v24 }
 0x2fb   :  { %1736 = vmatprep.subr.bf16.mxu1 %v4228_v50  ;;  %1840 = vmatpush1.bf16.msra.mxu0 %v4331_v14 }
 0x2fc   :  { %1841 = vmatprep.subr.bf16.mxu0 %v4337_v20 }
 0x2fd   :  { %1637 = vmatmul.mubr.bf16.vlgmr.msra.gmra.mxu1 %v5438_v17 }
 0x2fe   :  { %1737 = vmatpush1.bf16.msra.mxu1 %v4241_v59  ;;  %2650 = vmatprep.mubr.msk.bf16.mxu1 %vm210_vm1, %v5439_v6 }
 0x2ff   :  { %1738 = vmatprep.subr.bf16.mxu1 %v4247_v60  ;;  %1842 = vmatpush1.bf16.msra.mxu0 %v4348_v54 }
 0x300   :  { %1851 = vmatprep.subr.bf16.mxu0 %v4354_v45 }
 0x302   :  { %1739 = vmatpush1.bf16.msra.mxu1 %v4257_v61 }
 0x303   :  { %1740 = vmatprep.subr.bf16.mxu1 %v4263_v62  ;;  %1852 = vmatpush2.bf16.msra.mxu0 %v4362_v26 }
 0x304   :  { %1853 = vmatprep.subr.bf16.mxu0 %v4368_v27 }
 0x306   :  { %1741 = vmatpush1.bf16.msra.mxu1 %v5432_v19 }
 0x307   :  { %1742 = vmatprep.subr.bf16.mxu1 %v5433_v25  ;;  %1854 = vmatpush2.bf16.msra.mxu0 %v4376_v28  ;;  %v5440_v25 = vmax.f32 %v4736_v2, %v4819_v1  ;;  %v5445_v1 = vld [vmem:[#allocation21_spill] sm:$0xff] }
 0x308   :  { %1855 = vmatprep.subr.bf16.mxu0 %v4382_v30 }
 0x30a   :  { %1743 = vmatpush1.bf16.msra.mxu1 %v5434_v40 }
 0x30b   :  { %1744 = vmatprep.subr.bf16.mxu1 %v5435_v16  ;;  %1856 = vmatpush2.bf16.msra.mxu0 %v4390_v35 }
 0x30c   :  { %1857 = vmatprep.subr.bf16.mxu0 %v4396_v36 }
 0x30d   :  { %v1407_v42 = vpop.f32.mrf.mxu1 }
 0x30e   :  { %v1408_v17 = vadd.f32 %v1407_v42, %v4787_v18  ;;  %1745 = vmatpush1.bf16.msra.mxu1 %v4301_v5  ;;  %v4902_v18 = vsel %vm210_vm1, %v4615_v53, %v4834_v29  ;;  %v5441_v42 = vmax.f32 %v4748_v7, %v4827_v0  ;;  %v5443_v7 = vld [vmem:[#allocation18_spill] sm:$0xff]  ;;  %v5444_v0 = vld [vmem:[#allocation19_spill] sm:$0xff] }
 0x30f   :  { %v1409_v6 = vpop.f32.mrf.mxu1  ;;  %1746 = vmatprep.subr.bf16.mxu1 %v5437_v41  ;;  %1858 = vmatpush2.bf16.msra.mxu0 %v4405_v51 }
 0x310   :  { %v4895_v40 = vmax.f32 %v5440_v25, %v1408_v17  ;;  %v1410_v16 = vadd.f32 %v1409_v6, %v4792_v58  ;;  %1876 = vmatprep.subr.bf16.mxu0 %v4417_v33  ;;  %v5442_v58 = vld [vmem:[#allocation12_spill] sm:$0xff]  ;;  %v5446_v6 = vld [vmem:[#allocation22_spill] sm:$0xff]  ;;  %v5447_v17 = vld [vmem:[#allocation23_spill] sm:$0xff] }
 0x311   :  { %v1411_v19 = vpop.f32.mrf.mxu1 }
 0x312   :  { %v4907_v41 = vmax.f32 %v5441_v42, %v1410_v16  ;;  %1747 = vmatpush1.bf16.msra.mxu1 %v4317_v9  ;;  %1860 = vmatmul.mubr.bf16.vlgmr.msra.gmra.mxu0 %v4902_v18 }
 0x313   :  { %v1412_v2 = vpop.f32.mrf.mxu1  ;;  %1748 = vmatprep.subr.bf16.mxu1 %v4323_v15  ;;  %1877 = vmatpush1.bf16.msra.mxu0 %v5424_v55 }
 0x314   :  { %1878 = vmatprep.subr.bf16.mxu0 %v5425_v63  ;;  %1908 = vmatprep.mubr.bf16.mxu0 %v5442_v58 }
 0x316   :  { %1749 = vmatpush1.bf16.msra.mxu1 %v4331_v14 }
 0x317   :  { %1750 = vmatprep.subr.bf16.mxu1 %v4337_v20  ;;  %1879 = vmatpush1.bf16.msra.mxu0 %v5427_v56 }
 0x318   :  { %1880 = vmatprep.subr.bf16.mxu0 %v5428_v3 }
 0x31a   :  { %1751 = vmatpush1.bf16.msra.mxu1 %v4348_v54 }
 0x31b   :  { %1760 = vmatprep.subr.bf16.mxu1 %v4354_v45  ;;  %1881 = vmatpush1.bf16.msra.mxu0 %v4465_v49 }
 0x31c   :  { %1882 = vmatprep.subr.bf16.mxu0 %v4471_v52 }
 0x31e   :  { %1761 = vmatpush2.bf16.msra.mxu1 %v4362_v26 }
 0x31f   :  { %1762 = vmatprep.subr.bf16.mxu1 %v4368_v27  ;;  %1883 = vmatpush1.bf16.msra.mxu0 %v4479_v11 }
 0x320   :  { %1884 = vmatprep.subr.bf16.mxu0 %v4485_v39 }
 0x322   :  { %1763 = vmatpush2.bf16.msra.mxu1 %v4376_v28 }
 0x323   :  { %1764 = vmatprep.subr.bf16.mxu1 %v4382_v30  ;;  %1885 = vmatpush1.bf16.msra.mxu0 %v4493_v44 }
 0x324   :  { %1886 = vmatprep.subr.bf16.mxu0 %v4499_v46 }
 0x326   :  { %1765 = vmatpush2.bf16.msra.mxu1 %v4390_v35 }
 0x327   :  { %1766 = vmatprep.subr.bf16.mxu1 %v4396_v36  ;;  %1887 = vmatpush1.bf16.msra.mxu0 %v4507_v57 }
 0x328   :  { %1888 = vmatprep.subr.bf16.mxu0 %v4513_v8 }
 0x32a   :  { %1767 = vmatpush2.bf16.msra.mxu1 %v4405_v51 }
 0x32b   :  { %1786 = vmatprep.subr.bf16.mxu1 %v4417_v33  ;;  %1889 = vmatpush1.bf16.msra.mxu0 %v4521_v34 }
 0x32c   :  { %1890 = vmatprep.subr.bf16.mxu0 %v4527_v38 }
 0x32d   :  { %1769 = vmatmul.mubr.bf16.vlgmr.msra.gmra.mxu1 %v5442_v58 }
 0x32e   :  { %1787 = vmatpush1.bf16.msra.mxu1 %v5424_v55  ;;  %1818 = vmatprep.mubr.bf16.mxu1 %v4743_v13 }
 0x32f   :  { %1788 = vmatprep.subr.bf16.mxu1 %v5425_v63  ;;  %1891 = vmatpush1.bf16.msra.mxu0 %v4537_v10 }
 0x330   :  { %1892 = vmatprep.subr.bf16.mxu0 %v5443_v7 }
 0x332   :  { %1789 = vmatpush1.bf16.msra.mxu1 %v5427_v56  ;;  %v4946_v53 = vpop.f32.mrf.mxu0 }
 0x333   :  { %1790 = vmatprep.subr.bf16.mxu1 %v5428_v3  ;;  %1893 = vmatpush2.bf16.msra.mxu0 %v5444_v0 }
 0x334   :  { %1894 = vmatprep.subr.bf16.mxu0 %v5445_v1  ;;  %v4951_v19 = vpop.f32.mrf.mxu0 }
 0x336   :  { %1791 = vmatpush1.bf16.msra.mxu1 %v4465_v49  ;;  %v1551_v25 = vpop.f32.mrf.mxu0 }
 0x337   :  { %1792 = vmatprep.subr.bf16.mxu1 %v4471_v52  ;;  %1895 = vmatpush2.bf16.msra.mxu0 %v4564_v48  ;;  %v5454_v25 = vld [vmem:[#allocation7_spill] sm:$0xff] }
 0x338   :  { %1896 = vmatprep.subr.bf16.mxu0 %v4620_v12  ;;  %v1552_v16 = vpop.f32.mrf.mxu0 }
 0x339   :  { %v5448_v16 = vld [vmem:[#allocation8_spill] sm:$0xff] }
 0x33a   :  { %1793 = vmatpush1.bf16.msra.mxu1 %v4479_v11 }
 0x33b   :  { %1794 = vmatprep.subr.bf16.mxu1 %v4485_v39  ;;  %1897 = vmatpush2.bf16.msra.mxu0 %v4630_v21 }
 0x33c   :  { %1898 = vmatprep.subr.bf16.mxu0 %v4636_v31 }
 0x33e   :  { %1795 = vmatpush1.bf16.msra.mxu1 %v4493_v44 }
 0x33f   :  { %1796 = vmatprep.subr.bf16.mxu1 %v4499_v46  ;;  %1899 = vmatpush2.bf16.msra.mxu0 %v4644_v37 }
 0x340   :  { %1900 = vmatprep.subr.bf16.mxu0 %v4650_v4 }
 0x342   :  { %1797 = vmatpush1.bf16.msra.mxu1 %v4507_v57 }
 0x343   :  { %1798 = vmatprep.subr.bf16.mxu1 %v4513_v8  ;;  %1901 = vmatpush2.bf16.msra.mxu0 %v5446_v6 }
 0x344   :  { %1902 = vmatprep.subr.bf16.mxu0 %v5447_v17 }
 0x346   :  { %1799 = vmatpush1.bf16.msra.mxu1 %v4521_v34 }
 0x347   :  { %1800 = vmatprep.subr.bf16.mxu1 %v4527_v38  ;;  %1903 = vmatpush2.bf16.msra.mxu0 %v4672_v47 }
 0x348   :  { %1904 = vmatprep.subr.bf16.mxu0 %v4680_v23 }
 0x34a   :  { %1801 = vmatpush1.bf16.msra.mxu1 %v4537_v10 }
 0x34b   :  { %1802 = vmatprep.subr.bf16.mxu1 %v5443_v7  ;;  %1905 = vmatpush2.bf16.msra.mxu0 %v4690_v22 }
 0x34c   :  { %1906 = vmatprep.subr.bf16.mxu0 %v4696_v43 }
 0x34d   :  { %v1457_v42 = vpop.f32.mrf.mxu1 }
 0x34e   :  { %v4978_v2 = vadd.f32 %v4854_v32, %v1457_v42  ;;  %1803 = vmatpush2.bf16.msra.mxu1 %v5444_v0  ;;  %v5449_v42 = vld [vmem:[#allocation13_spill] sm:$0xff]  ;;  %v4993_v0 = vpop.permute.xlu1 %1960 }
 0x34f   :  { %v1459_v58 = vpop.f32.mrf.mxu1  ;;  %1804 = vmatprep.subr.bf16.mxu1 %v5445_v1  ;;  %1907 = vmatpush2.bf16.msra.mxu0 %v4704_v24 }
 0x350   :  { %v4986_v13 = vadd.f32 %v5448_v16, %v1459_v58  ;;  %2008 = vmatprep.subr.bf16.mxu0 %v4228_v50  ;;  %v5452_v58 = vld [vmem:[#allocation4_spill] sm:$0xff]  ;;  %v5453_v16 = vld [vmem:[#allocation6_spill] sm:$0xff] }
 0x351   :  { %v1461_v7 = vpop.f32.mrf.mxu1 }
 0x352   :  { %1805 = vmatpush2.bf16.msra.mxu1 %v4564_v48  ;;  %1909 = vmatmul.mubr.bf16.vlgmr.msra.gmra.mxu0 %v5449_v42  ;;  %v5450_v7 = vld [vmem:[#allocation3_spill] sm:$0xff] }
 0x353   :  { %v1462_v1 = vpop.f32.mrf.mxu1  ;;  %1806 = vmatprep.subr.bf16.mxu1 %v4620_v12  ;;  %2009 = vmatpush1.bf16.msra.mxu0 %v4241_v59 }
 0x354   :  { %2010 = vmatprep.subr.bf16.mxu0 %v4247_v60  ;;  %2654 = vmatprep.mubr.msk.bf16.mxu0 %vm210_vm1, %v4993_v0  ;;  %v5451_v1 = vld [vmem:[#allocation11_spill] sm:$0xff] }
 0x356   :  { %1807 = vmatpush2.bf16.msra.mxu1 %v4630_v21 }
 0x357   :  { %1808 = vmatprep.subr.bf16.mxu1 %v4636_v31  ;;  %2011 = vmatpush1.bf16.msra.mxu0 %v4257_v61 }
 0x358   :  { %2012 = vmatprep.subr.bf16.mxu0 %v4263_v62 }
 0x35a   :  { %1809 = vmatpush2.bf16.msra.mxu1 %v4644_v37 }
 0x35b   :  { %1810 = vmatprep.subr.bf16.mxu1 %v4650_v4  ;;  %2013 = vmatpush1.bf16.msra.mxu0 %v5450_v7 }
 0x35c   :  { %2014 = vmatprep.subr.bf16.mxu0 %v5451_v1 }
 0x35e   :  { %1811 = vmatpush2.bf16.msra.mxu1 %v5446_v6 }
 0x35f   :  { %1812 = vmatprep.subr.bf16.mxu1 %v5447_v17  ;;  %2015 = vmatpush1.bf16.msra.mxu0 %v5452_v58 }
 0x360   :  { %2016 = vmatprep.subr.bf16.mxu0 %v5453_v16 }
 0x362   :  { %1813 = vmatpush2.bf16.msra.mxu1 %v4672_v47  ;;  %v5013_v42 = vpop.f32.mrf.mxu0 }
 0x363   :  { %1814 = vmatprep.subr.bf16.mxu1 %v4680_v23  ;;  %2017 = vmatpush1.bf16.msra.mxu0 %v4301_v5  ;;  %v5455_v23 = vld [vmem:[#allocation2_spill] sm:$0xff] }
 0x364   :  { %v5017_v32 = vpop.f32.mrf.mxu0  ;;  %2018 = vmatprep.subr.bf16.mxu0 %v5454_v25 }
 0x366   :  { %1815 = vmatpush2.bf16.msra.mxu1 %v4690_v22  ;;  %v1683_v6 = vpop.f32.mrf.mxu0 }
 0x367   :  { %1816 = vmatprep.subr.bf16.mxu1 %v4696_v43  ;;  %2019 = vmatpush1.bf16.msra.mxu0 %v4317_v9  ;;  %v5456_v6 = vld [vmem:[#allocation20_spill] sm:$0xff] }
 0x368   :  { %v1684_v17 = vpop.f32.mrf.mxu0  ;;  %2020 = vmatprep.subr.bf16.mxu0 %v4323_v15 }
 0x36a   :  { %1817 = vmatpush2.bf16.msra.mxu1 %v4704_v24 }
 0x36b   :  { %1917 = vmatprep.subr.bf16.mxu1 %v4228_v50  ;;  %2021 = vmatpush1.bf16.msra.mxu0 %v4331_v14 }
 0x36c   :  { %2022 = vmatprep.subr.bf16.mxu0 %v4337_v20 }
 0x36d   :  { %1819 = vmatmul.mubr.bf16.vlgmr.msra.gmra.mxu1 %v5455_v23 }
 0x36e   :  { %1918 = vmatpush1.bf16.msra.mxu1 %v4241_v59  ;;  %2653 = vmatprep.mubr.msk.bf16.mxu1 %vm210_vm1, %v5456_v6 }
 0x36f   :  { %1919 = vmatprep.subr.bf16.mxu1 %v4247_v60  ;;  %2023 = vmatpush1.bf16.msra.mxu0 %v4348_v54 }
 0x370   :  { %2032 = vmatprep.subr.bf16.mxu0 %v4354_v45 }
 0x372   :  { %1920 = vmatpush1.bf16.msra.mxu1 %v4257_v61  ;;  %v3082_v61 = vld [vmem:[%s5288_s5 + $0x38] sm:$0xff]  }
 0x373   :  { %1921 = vmatprep.subr.bf16.mxu1 %v4263_v62  ;;  %2033 = vmatpush2.bf16.msra.mxu0 %v4362_v26  ;;  %v5457_v62 = vmax.f32 %v4895_v40, %v4978_v2 }
 0x374   :  { %2034 = vmatprep.subr.bf16.mxu0 %v4368_v27 }
 0x376   :  { %1922 = vmatpush1.bf16.msra.mxu1 %v5450_v7  ;;  %v5458_v7 = vmov 0.0  }
 0x377   :  { %1923 = vmatprep.subr.bf16.mxu1 %v5451_v1  ;;  %2035 = vmatpush2.bf16.msra.mxu0 %v4376_v28 }
 0x378   :  { %2036 = vmatprep.subr.bf16.mxu0 %v4382_v30 }
 0x37a   :  { %1924 = vmatpush1.bf16.msra.mxu1 %v5452_v58 }
 0x37b   :  { %1925 = vmatprep.subr.bf16.mxu1 %v5453_v16  ;;  %2037 = vmatpush2.bf16.msra.mxu0 %v4390_v35 }
 0x37c   :  { %2038 = vmatprep.subr.bf16.mxu0 %v4396_v36 }
 0x37d   :  { %v1588_v50 = vpop.f32.mrf.mxu1 }
 0x37e   :  { %v1589_v59 = vadd.f32 %v1588_v50, %v4946_v53  ;;  %1926 = vmatpush1.bf16.msra.mxu1 %v4301_v5  ;;  %v1962_v5 = vsel %vm210_vm1, %v4834_v29, %v4993_v0  ;;  %v3084_v29 = vld [vmem:[%s5288_s5 + $0x28] sm:$0xff]   ;;  %v3103_v50 = vld [vmem:[%s5290_s6 + $0x20] sm:$0xff]  }
 0x37f   :  { %v1590_v60 = vpop.f32.mrf.mxu1  ;;  %1927 = vmatprep.subr.bf16.mxu1 %v5454_v25  ;;  %2039 = vmatpush2.bf16.msra.mxu0 %v4405_v51  ;;  %v5459_v25 = vmax.f32 %v4907_v41, %v4986_v13  ;;  %v3099_v41 = vld [vmem:[%s5290_s6 + $0x28] sm:$0xff]  }
 0x380   :  { %v5057_v23 = vmax.f32 %v5457_v62, %v1589_v59  ;;  %v1591_v17 = vadd.f32 %v1590_v60, %v4951_v19  ;;  %2953 = vmatprep.subr.bf16.mxu0 %v5458_v7  ;;  %v3083_v19 = vld [vmem:[%s5288_s5 + $0x30] sm:$0xff]   ;;  %v3100_v0 = vld [vmem:[%s5290_s6 + $0xe8] sm:$0xff]   ;;  %v3104_v60 = vld [vmem:[%s5290_s6 + $0xe0] sm:$0xff]  }
 0x381   :  { %v1592_v53 = vpop.f32.mrf.mxu1  ;;  %v3105_v62 = vld [vmem:[%s5290_s6 + $0xa0] sm:$0xff]  }
 0x382   :  { %v5067_v1 = vmax.f32 %v5459_v25, %v1591_v17  ;;  %1928 = vmatpush1.bf16.msra.mxu1 %v4317_v9  ;;  %2041 = vmatmul.mubr.bf16.vlgmr.msra.gmra.mxu0 %v1962_v5  ;;  %v3085_v9 = vld [vmem:[%s5288_s5 + $0x20] sm:$0xff]   ;;  %v3107_v17 = vld [vmem:[%s5290_s6 + $0x18] sm:$0xff]  }
 0x383   :  { %v1593_v40 = vpop.f32.mrf.mxu1  ;;  %1929 = vmatprep.subr.bf16.mxu1 %v4323_v15  ;;  %2954 = vmatpush3.bf16.msra.mxu0 %v3082_v61  ;;  %v3086_v15 = vld [vmem:[%s5288_s5 + $0x18] sm:$0xff]  }
 0x384   :  { %2955 = vmatprep.subr.bf16.mxu0 %v5458_v7  ;;  %2969 = vmatprep.mubr.msk.bf16.mxu0 %vm3179_vm0, %v5458_v7  ;;  %v3109_v5 = vld [vmem:[%s5290_s6 + $0x98] sm:$0xff]  }
 0x386   :  { %1930 = vmatpush1.bf16.msra.mxu1 %v4331_v14  ;;  %v3087_v14 = vld [vmem:[%s5288_s5 + $0x10] sm:$0xff]  }
 0x387   :  { %1931 = vmatprep.subr.bf16.mxu1 %v4337_v20  ;;  %2956 = vmatpush3.bf16.msra.mxu0 %v3083_v19  ;;  %v3088_v20 = vld [vmem:[%s5288_s5 + $0x8] sm:$0xff]   ;;  %v3110_v19 = vld [vmem:[%s5290_s6 + $0x50] sm:$0xff]  }
 0x388   :  { %2957 = vmatprep.subr.bf16.mxu0 %v5458_v7 }
 0x38a   :  { %1932 = vmatpush1.bf16.msra.mxu1 %v4348_v54  ;;  %v3089_v54 = vld [vmem:[%s5288_s5] sm:$0xff]  }
 0x38b   :  { %1941 = vmatprep.subr.bf16.mxu1 %v4354_v45  ;;  %2958 = vmatpush3.bf16.msra.mxu0 %v3084_v29  ;;  %v5460_v45 = vld [vmem:[#allocation10_spill] sm:$0xff]  ;;  %v3111_v29 = vld [vmem:[%s5290_s6 + $0x10] sm:$0xff]  }
 0x38c   :  { %2959 = vmatprep.subr.bf16.mxu0 %v5458_v7 }
 0x38e   :  { %1942 = vmatpush2.bf16.msra.mxu1 %v4362_v26  ;;  %v2066_v26 = vld [vmem:[%s5289_s2] sm:$0xf] }
 0x38f   :  { %1943 = vmatprep.subr.bf16.mxu1 %v4368_v27  ;;  %2960 = vmatpush3.bf16.msra.mxu0 %v3085_v9  ;;  %v3112_v9 = vld [vmem:[%s5290_s6 + $0xd0] sm:$0xff]  }
 0x390   :  { %2961 = vmatprep.subr.bf16.mxu0 %v5458_v7 }
 0x392   :  { %1944 = vmatpush2.bf16.msra.mxu1 %v4376_v28 }
 0x393   :  { %1945 = vmatprep.subr.bf16.mxu1 %v4382_v30  ;;  %2962 = vmatpush3.bf16.msra.mxu0 %v3086_v15  ;;  %v3113_v15 = vld [vmem:[%s5290_s6 + $0x90] sm:$0xff]  }
 0x394   :  { %2963 = vmatprep.subr.bf16.mxu0 %v5458_v7 }
 0x396   :  { %1946 = vmatpush2.bf16.msra.mxu1 %v4390_v35 }
 0x397   :  { %1947 = vmatprep.subr.bf16.mxu1 %v4396_v36  ;;  %2964 = vmatpush3.bf16.msra.mxu0 %v3087_v14  ;;  %v5461_v36 = vld [vmem:[#allocation18_spill] sm:$0xff]  ;;  %v3114_v14 = vld [vmem:[%s5290_s6 + $0x48] sm:$0xff]  }
 0x398   :  { %2965 = vmatprep.subr.bf16.mxu0 %v5458_v7 }
 0x39a   :  { %1948 = vmatpush2.bf16.msra.mxu1 %v4405_v51 }
 0x39b   :  { %1967 = vmatprep.subr.bf16.mxu1 %v4417_v33  ;;  %2966 = vmatpush3.bf16.msra.mxu0 %v3088_v20  ;;  %v3115_v20 = vld [vmem:[%s5290_s6 + $0x8] sm:$0xff]  }
 0x39c   :  { %2967 = vmatprep.subr.bf16.mxu0 %v5458_v7  ;;  %v3108_v7 = vld [vmem:[%s5290_s6 + $0xd8] sm:$0xff]  }
 0x39d   :  { %1950 = vmatmul.mubr.bf16.vlgmr.msra.gmra.mxu1 %v5460_v45  ;;  %v3117_v45 = vld [vmem:[%s5290_s6 + $0x88] sm:$0xff]  }
 0x39e   :  { %1968 = vmatpush1.bf16.msra.mxu1 %v5424_v55  ;;  %1999 = vmatprep.mubr.bf16.mxu1 %v4902_v18  ;;  %v3096_v55 = vld [vmem:[%s5290_s6 + $0xf0] sm:$0xff]  }
 0x39f   :  { %1969 = vmatprep.subr.bf16.mxu1 %v5425_v63  ;;  %2968 = vmatpush3.bf16.msra.mxu0 %v3089_v54  ;;  %v3097_v63 = vld [vmem:[%s5290_s6 + $0xb0] sm:$0xff]   ;;  %v3116_v54 = vld [vmem:[%s5290_s6 + $0xc8] sm:$0xff]  }
 0x3a2   :  { %1970 = vmatpush1.bf16.msra.mxu1 %v5427_v56  ;;  %v5121_v27 = vpop.f32.mrf.mxu0  ;;  %2970 = vmatmul.mubr.bf16.vlgmr.msra.gmra.mxu0 %v2066_v26  ;;  %v3098_v56 = vld [vmem:[%s5290_s6 + $0x68] sm:$0xff]   ;;  %v3118_v26 = vld [vmem:[%s5290_s6 + $0x40] sm:$0xff]  }
 0x3a3   :  { %1971 = vmatprep.subr.bf16.mxu1 %v5428_v3 }
 0x3a4   :  { %v5124_v28 = vpop.f32.mrf.mxu0 }
 0x3a6   :  { %1972 = vmatpush1.bf16.msra.mxu1 %v4465_v49  ;;  %v1733_v30 = vpop.f32.mrf.mxu0  ;;  %v5462_v49 = vld [vmem:[#allocation19_spill] sm:$0xff] }
 0x3a7   :  { %1973 = vmatprep.subr.bf16.mxu1 %v4471_v52  ;;  %v3121_v30 = vld [vmem:[%s5290_s6 + $0x80] sm:$0xff]  }
 0x3a8   :  { %v1734_v35 = vpop.f32.mrf.mxu0 }
 0x3aa   :  { %1974 = vmatpush1.bf16.msra.mxu1 %v4479_v11  ;;  %v5463_v11 = vld [vmem:[#allocation21_spill] sm:$0xff] }
 0x3ab   :  { %1975 = vmatprep.subr.bf16.mxu1 %v4485_v39 }
 0x3ae   :  { %1976 = vmatpush1.bf16.msra.mxu1 %v4493_v44 }
 0x3af   :  { %1977 = vmatprep.subr.bf16.mxu1 %v4499_v46 }
 0x3b2   :  { %1978 = vmatpush1.bf16.msra.mxu1 %v4507_v57 }
 0x3b3   :  { %1979 = vmatprep.subr.bf16.mxu1 %v4513_v8  ;;  %v5465_v8 = vld [vmem:[#allocation23_spill] sm:$0xff] }
 0x3b6   :  { %1980 = vmatpush1.bf16.msra.mxu1 %v4521_v34 }
 0x3b7   :  { %1981 = vmatprep.subr.bf16.mxu1 %v4527_v38 }
 0x3ba   :  { %1982 = vmatpush1.bf16.msra.mxu1 %v4537_v10  ;;  %v5464_v10 = vld [vmem:[#allocation22_spill] sm:$0xff] }
 0x3bb   :  { %1983 = vmatprep.subr.bf16.mxu1 %v5461_v36 }
 0x3bd   :  { %v1638_v51 = vpop.f32.mrf.mxu1 }
 0x3be   :  { %v1680_v33 = vadd.f32 %v5013_v42, %v1638_v51  ;;  %1984 = vmatpush2.bf16.msra.mxu1 %v5462_v49  ;;  %v3102_v42 = vld [vmem:[%s5290_s6 + $0x60] sm:$0xff]  }
 0x3bf   :  { %v1640_v52 = vpop.f32.mrf.mxu1  ;;  %1985 = vmatprep.subr.bf16.mxu1 %v5463_v11 }
 0x3c0   :  { %v1686_v39 = vmax.f32 %v5057_v23, %v1680_v33  ;;  %v1682_v44 = vadd.f32 %v5017_v32, %v1640_v52  ;;  %v3101_v32 = vld [vmem:[%s5290_s6 + $0xa8] sm:$0xff]   ;;  %v3106_v23 = vld [vmem:[%s5290_s6 + $0x58] sm:$0xff]  }
 0x3c1   :  { %v1642_v46 = vpop.f32.mrf.mxu1 }
 0x3c2   :  { %v1687_v57 = vmax.f32 %v5067_v1, %v1682_v44  ;;  %1986 = vmatpush2.bf16.msra.mxu1 %v4564_v48  ;;  %v5466_v48 = vld [vmem:[#allocation24_spill] sm:$0xff] }
 0x3c3   :  { %v1643_v38 = vpop.f32.mrf.mxu1  ;;  %1987 = vmatprep.subr.bf16.mxu1 %v4620_v12 }
 0x3c6   :  { %1988 = vmatpush2.bf16.msra.mxu1 %v4630_v21 }
 0x3c7   :  { %1989 = vmatprep.subr.bf16.mxu1 %v4636_v31  ;;  %v5467_v31 = vld [vmem:[#allocation26_spill] sm:$0xff] }
 0x3ca   :  { %1990 = vmatpush2.bf16.msra.mxu1 %v4644_v37  ;;  %v3090_v37 = vld [vmem:[%s5290_s6 + $0x78] sm:$0xff]  }
 0x3cb   :  { %1991 = vmatprep.subr.bf16.mxu1 %v4650_v4  ;;  %v3091_v4 = vld [vmem:[%s5290_s6 + $0x38] sm:$0xff]  }
 0x3ce   :  { %1992 = vmatpush2.bf16.msra.mxu1 %v5464_v10 }
 0x3cf   :  { %1993 = vmatprep.subr.bf16.mxu1 %v5465_v8 }
 0x3d2   :  { %1994 = vmatpush2.bf16.msra.mxu1 %v4672_v47  ;;  %v5153_v34 = vpop.f32.mrf.mxu0  ;;  %v3092_v47 = vld [vmem:[%s5290_s6 + $0xf8] sm:$0xff]  }
 0x3d3   :  { %1995 = vmatprep.subr.bf16.mxu1 %v5466_v48  ;;  %2791 = vmatprep.subr.bf16.mxu0 %v3092_v47  ;;  %v2655_v48 = vld [vmem:[%s5291_s7 + $0x3] ss:$0 sm:$0xff] }
 0x3d4   :  { %v5156_v13 = vpop.f32.mrf.mxu0 }
 0x3d6   :  { %1996 = vmatpush2.bf16.msra.mxu1 %v4690_v22  ;;  %v1865_v12 = vpop.f32.mrf.mxu0  ;;  %v3095_v22 = vld [vmem:[%s5290_s6 + $0x30] sm:$0xff]  }
 0x3d7   :  { %1997 = vmatprep.subr.bf16.mxu1 %v4696_v43  ;;  %v3093_v43 = vld [vmem:[%s5290_s6 + $0xb8] sm:$0xff]  }
 0x3d8   :  { %v1866_v21 = vpop.f32.mrf.mxu0  ;;  %2792 = vmatpush3.bf16.msra.mxu0 %v3093_v43 }
 0x3d9   :  { %2793 = vmatprep.subr.bf16.mxu0 %v3096_v55 }
 0x3da   :  { %1998 = vmatpush2.bf16.msra.mxu1 %v4704_v24  ;;  %v3094_v24 = vld [vmem:[%s5290_s6 + $0x70] sm:$0xff]  }
 0x3db   :  { %2769 = vmatprep.subr.bf16.mxu1 %v3090_v37 }
 0x3dc   :  { %2794 = vmatpush3.bf16.msra.mxu0 %v3097_v63 }
 0x3dd   :  { %2000 = vmatmul.mubr.bf16.vlgmr.msra.gmra.mxu1 %v5467_v31  ;;  %2795 = vmatprep.subr.bf16.mxu0 %v3100_v0 }
 0x3de   :  { %2770 = vmatpush3.bf16.msra.mxu1 %v3091_v4 }
 0x3df   :  { %2771 = vmatprep.subr.bf16.mxu1 %v3094_v24  ;;  %v2052_v24 = vlaneseq }
 0x3e0   :  { %2796 = vmatpush3.bf16.msra.mxu0 %v3101_v32 }
 0x3e1   :  { %2797 = vmatprep.subr.bf16.mxu0 %v3104_v60 }
 0x3e2   :  { %2772 = vmatpush3.bf16.msra.mxu1 %v3095_v22  ;;  %v2053_v22 = vshrl.u32 %v2052_v24, 7 }
 0x3e3   :  { %2773 = vmatprep.subr.bf16.mxu1 %v3098_v56  ;;  %v31_v56 = vld [vmem:[%s5291_s7 + $0x1] sm:$0x3] }
 0x3e4   :  { %2798 = vmatpush3.bf16.msra.mxu0 %v3105_v62  ;;  %v2054_v63 = vsub.s32 0, %v2053_v22 }
 0x3e5   :  { %2799 = vmatprep.subr.bf16.mxu0 %v3108_v7 }
 0x3e6   :  { %2774 = vmatpush3.bf16.msra.mxu1 %v3099_v41 }
 0x3e7   :  { %2775 = vmatprep.subr.bf16.mxu1 %v3102_v42 }
 0x3e8   :  { %2800 = vmatpush3.bf16.msra.mxu0 %v3109_v5 }
 0x3e9   :  { %2801 = vmatprep.subr.bf16.mxu0 %v3112_v9 }
 0x3ea   :  { %2776 = vmatpush3.bf16.msra.mxu1 %v3103_v50 }
 0x3eb   :  { %2777 = vmatprep.subr.bf16.mxu1 %v3106_v23 }
 0x3ec   :  { %2802 = vmatpush3.bf16.msra.mxu0 %v3113_v15 }
 0x3ed   :  { %v1770_v3 = vpop.f32.mrf.mxu1  ;;  %2803 = vmatprep.subr.bf16.mxu0 %v3116_v54 }
 0x3ee   :  { %v1771_v18 = vadd.f32 %v1770_v3, %v5121_v27  ;;  %2778 = vmatpush3.bf16.msra.mxu1 %v3107_v17  ;;  %v3119_v27 = vld [vmem:[%s5290_s6] sm:$0xff]  }
 0x3ef   :  { %v1772_v2 = vpop.f32.mrf.mxu1  ;;  %2779 = vmatprep.subr.bf16.mxu1 %v3110_v19  ;;  %v2574_v3 = vld [vmem:[%s5291_s7] ss:$0 sm:$0xff] }
 0x3f0   :  { %v5199_v58 = vmax.f32 %v1686_v39, %v1771_v18  ;;  %v1773_v16 = vadd.f32 %v1772_v2, %v5124_v28  ;;  %2804 = vmatpush3.bf16.msra.mxu0 %v3117_v45  ;;  %v3120_v28 = vld [vmem:[%s5290_s6 + $0xc0] sm:$0xff]   ;;  %v2058_v18 = vsub.s32 1, %v2053_v22 }
 0x3f1   :  { %v1774_v6 = vpop.f32.mrf.mxu1  ;;  %2805 = vmatprep.subr.bf16.mxu0 %v3120_v28 }
 0x3f2   :  { %v5208_v59 = vmax.f32 %v1687_v57, %v1773_v16  ;;  %2780 = vmatpush3.bf16.msra.mxu1 %v3111_v29  ;;  %v5468_v16 = vld [vmem:[#allocation14_spill] sm:$0xff] }
 0x3f3   :  { %v1775_v61 = vpop.f32.mrf.mxu1  ;;  %2781 = vmatprep.subr.bf16.mxu1 %v3114_v14  ;;  %v480_v42 = vadd.f32 %v2574_v3, %v5468_v16  ;;  %v2664_v14 = vld [vmem:[%s5291_s7 + $0x4] ss:$0 sm:$0xff] }
 0x3f4   :  { %2806 = vmatpush3.bf16.msra.mxu0 %v3121_v30  ;;  %v2059_v61 = vrot.slane %v31_v56, %v2058_v18 }
 0x3f5   :  { %v481_v7 = vmax.f32 %v480_v42, 0.0 }
 0x3f6   :  { %2782 = vmatpush3.bf16.msra.mxu1 %v3115_v20 }
 0x3f7   :  { %2783 = vmatprep.subr.bf16.mxu1 %v3118_v26  ;;  %v2178_v19 = vpack.c.bf16 %v481_v7, %v481_v7 }
 0x3fa   :  { %2784 = vmatpush3.bf16.msra.mxu1 %v3119_v27 }
 0x412   :  { %v1910_v53 = vpop.f32.mrf.mxu0 }
 0x414   :  { %v1912_v25 = vpop.f32.mrf.mxu0 }
 0x416   :  { %v1914_v1 = vpop.f32.mrf.mxu0 }
 0x418   :  { %v1915_v40 = vpop.f32.mrf.mxu0 }
 0x42d   :  { %v1820_v35 = vpop.f32.mrf.mxu1 }
 0x42e   :  { %v1862_v36 = vadd.f32 %v5153_v34, %v1820_v35 }
 0x42f   :  { %v1822_v51 = vpop.f32.mrf.mxu1 }
 0x430   :  { %v1868_v33 = vmax.f32 %v5199_v58, %v1862_v36  ;;  %v1864_v49 = vadd.f32 %v5156_v13, %v1822_v51  ;;  %v2055_v58 = vrot.slane %v31_v56, %v2054_v63 }
 0x431   :  { %v1824_v52 = vpop.f32.mrf.mxu1 }
 0x432   :  { %v1869_v11 = vmax.f32 %v5208_v59, %v1864_v49 }
 0x433   :  { %v1825_v39 = vpop.f32.mrf.mxu1 }
 0x442   :  { %v2042_v44 = vpop.f32.mrf.mxu0 }
 0x444   :  { %v2044_v46 = vpop.f32.mrf.mxu0 }
 0x446   :  { %v2046_v57 = vpop.f32.mrf.mxu0 }
 0x448   :  { %v2047_v38 = vpop.f32.mrf.mxu0 }
 0x45d   :  { %v1951_v10 = vpop.f32.mrf.mxu1 }
 0x45e   :  { %v1952_v55 = vadd.f32 %v1951_v10, %v1910_v53 }
 0x45f   :  { %v1953_v8 = vpop.f32.mrf.mxu1 }
 0x460   :  { %v1954_v41 = vadd.f32 %v1953_v8, %v1912_v25  ;;  %v1958_v2 = vmax.f32 %v1868_v33, %v1952_v55 }
 0x461   :  { %v1955_v34 = vpop.f32.mrf.mxu1 }
 0x462   :  { %v2171_v12 = vpop.f32.mrf.mxu0  ;;  %v1959_v50 = vmax.f32 %v1869_v11, %v1954_v41 }
 0x463   :  { %v1956_v21 = vpop.f32.mrf.mxu1  ;;  %v2172_v31 = vadd.f32 %v2655_v48, %v2171_v12 }
 0x464   :  { %v2971_v37 = vpop.f32.mrf.mxu0 }
 0x465   :  { %v2177_v13 = vmax.f32 %v2172_v31, 0.0 }
 0x466   :  { %v2174_v4 = vpop.f32.mrf.mxu0 }
 0x467   :  { %v2181_v47 = vpack.c.bf16 %v2177_v13, %v2177_v13 }
 0x468   :  { %v2972_v43 = vpop.f32.mrf.mxu0 }
 0x469   :  { %2516 = vmatprep.mubr.bf16.mxu0 %v2181_v47 }
 0x49d   :  { %v2001_v0 = vpop.f32.mrf.mxu1 }
 0x49e   :  { %v2043_v32 = vadd.f32 %v2042_v44, %v2001_v0 }
 0x49f   :  { %v2003_v6 = vpop.f32.mrf.mxu1 }
 0x4a0   :  { %v2049_v59 = vmax.f32 %v1958_v2, %v2043_v32  ;;  %v2045_v60 = vadd.f32 %v2044_v46, %v2003_v6 }
 0x4a1   :  { %v2005_v62 = vpop.f32.mrf.mxu1 }
 0x4a2   :  { %v2062_v23 = vadd.f32 %v2055_v58, %v2049_v59  ;;  %v2050_v17 = vmax.f32 %v1959_v50, %v2045_v60 }
 0x4a3   :  { %v2006_v5 = vpop.f32.mrf.mxu1 }
 0x4a4   :  { %v2063_v53 = vadd.f32 %v2059_v61, %v2050_v17  ;;  %v2064_v1 = vmax.f32 %v2062_v23, 0.0 }
 0x4a6   :  { %v2065_v25 = vmax.f32 %v2063_v53, 0.0  ;;  %v2179_v40 = vpack.c.bf16 %v2064_v1, %v2064_v1 }
 0x4a8   :  { %v2180_v29 = vpack.c.bf16 %v2065_v25, %v2065_v25  ;;  %2476 = vmatprep.mubr.bf16.mxu1 %v2179_v40 }
 0x4a9   :  { %2477 = vmatmul.mubr.bf16.vlgmr.msra.gmra.mxu1 %v2178_v19 }
 0x4aa   :  { %2517 = vmatmul.mubr.bf16.vlgmr.msra.gmra.mxu0 %v2180_v29 }
 0x569   :  { %v2785_v9 = vpop.f32.mrf.mxu1 }
 0x56a   :  { %v2807_v15 = vpop.f32.mrf.mxu0 }
 0x56b   :  { %v2786_v20 = vpop.f32.mrf.mxu1 }
 0x56c   :  { %v2787_v54 = vadd.f32 %v2786_v20, %v2785_v9  ;;  %v2808_v45 = vpop.f32.mrf.mxu0 }
 0x56d   :  { %v2809_v26 = vadd.f32 %v2808_v45, %v2807_v15  ;;  %v2788_v27 = vpop.f32.mrf.mxu1 }
 0x56e   :  { %v2479_v28 = vadd.f32 %v2787_v54, %v2664_v14  ;;  %v2810_v30 = vpop.f32.mrf.mxu0 }
 0x56f   :  { %v2789_v35 = vpop.f32.mrf.mxu1 }
 0x570   :  { %v2811_v36 = vpop.f32.mrf.mxu0  ;;  %v2519_v51 = vadd.f32 %v2809_v26, %v2479_v28 }
 0x572   :  { %2524 = vxpose.xlu0.b32.start.end [1/1] (short) (narrow) %v2519_v51, 8 }
 0x5ee   :  { %v2540_v33 = vpop.trf.xlu0 }
 0x5ef   :  { %2557 = vst.msk [vmem:[%s5292_s8] sm:$0x1] %vm2556_vm2, %v2540_v33 }

</bundles_post_ra>
